<compile_context>
chip_gen: v7x
topology: tpu7x:2x2x1
jax: 0.10.0
libtpu: 0.0.40
codegen_flags: <defaults>
</compile_context>

<pallas_src>
import functools

import jax
import jax.numpy as jnp
from jax.experimental import pallas as pl
from jax.experimental.pallas import tpu as pltpu

_PAD = 128  # lane-aligned zero extension on each side of the flattened image


# -----------------------------------------------------------------------------
# Host-side constants / parameter packing
# -----------------------------------------------------------------------------
def make_dx_masks(H, W):
    """(2, 1, S) f32 row-boundary masks for the flattened (row-major) layout:
    [0] is 1 where a dx=-1 tap stays inside the row (w >= 1),
    [1] is 1 where a dx=+1 tap stays inside the row (w <= W-2)."""
    S = H * W
    w = jnp.arange(S, dtype=jnp.int32) % W
    left = (w >= 1).astype(jnp.float32)
    right = (w <= W - 2).astype(jnp.float32)
    return jnp.stack([left, right]).reshape(2, 1, S)


def init_params(channel_num, key):
    """He-style init, PyTorch OIHW weight layout (for the f32 reference)."""
    C = channel_num
    ks = jax.random.split(key, 8)

    def conv_init(kw, kb, cin, cout):
        w = jax.random.normal(kw, (cout, cin, 3, 3), jnp.float32)
        w = w * jnp.sqrt(2.0 / (9 * cin))
        b = 0.01 * jax.random.normal(kb, (cout,), jnp.float32)
        return w, b

    wv, bv = conv_init(ks[0], ks[1], 3, C)          # vertex branch
    wg, bg = conv_init(ks[2], ks[3], 1, C)          # image-guidance branch
    wf, bf = conv_init(ks[4], ks[5], 2 * C, C)      # fusion
    wo, bo = conv_init(ks[6], ks[7], C, 3)          # output normals
    return dict(wv=wv, bv=bv, wg=wg, bg=bg, wf=wf, bf=bf, wo=wo, bo=bo)


def pack_params(p, H, W):
    """Repack to kernel layout: weights (9, Cout, Cin) bf16 (tap-major,
    k = ky*3 + kx), biases (Cout, 1) f32.  The vertex + guidance branches are
    fused into one conv over the 4 input channels with per-tap block-diagonal
    weights so their outputs stay stacked as [v ; g]."""
    C = p["wv"].shape[0]

    def pack_w(w):  # (O, I, 3, 3) -> (9, O, I)
        O, I = w.shape[0], w.shape[1]
        return jnp.transpose(w, (2, 3, 0, 1)).reshape(9, O, I)

    def pack_b(b):
        return b.reshape(-1, 1).astype(jnp.float32)

    wv9, wg9 = pack_w(p["wv"]), pack_w(p["wg"])
    w1 = jnp.zeros((9, 2 * C, 4), jnp.float32)
    w1 = w1.at[:, :C, :3].set(wv9)       # rows [0:C)  read channels 0..2 (vertices)
    w1 = w1.at[:, C:, 3:].set(wg9)       # rows [C:2C) read channel 3 (image)
    b1 = jnp.concatenate([p["bv"], p["bg"]])

    return dict(
        masks=make_dx_masks(H, W),
        w1=w1.astype(jnp.bfloat16), b1=pack_b(b1),
        wf=pack_w(p["wf"]).astype(jnp.bfloat16), bf=pack_b(p["bf"]),
        wo=pack_w(p["wo"]).astype(jnp.bfloat16), bo=pack_b(p["bo"]),
    )


# -----------------------------------------------------------------------------
# Fused kernel: (vertex+guidance) conv + fusion conv + output conv + L2 norm
# -----------------------------------------------------------------------------
def _ng_fused_kernel(x_ref, mk_ref, w1_ref, b1_ref, wf_ref, bf_ref,
                     wo_ref, bo_ref, o_ref, *, S, W):
    # Row-boundary masks (dx = -1 / +1).  The flat zero padding in conv9 already
    # zeroes the dy = -1/+1 out-of-image taps, so these two lane masks are the
    # only extra boundary handling needed.
    m_left = mk_ref[0]                                # (1, S) f32, 1 where w >= 1
    m_right = mk_ref[1]                               # (1, S) f32, 1 where w <= W-2

    def conv9(a, w_ref, b_ref):
        # 3x3 "same" (padding=1) conv on the flattened H*W lane axis.
        #   a: (Cin, S) f32, w_ref: (9, Cout, Cin) bf16, b_ref: (Cout, 1) f32
        cin, cout = a.shape[0], w_ref.shape[1]
        zpad = jnp.zeros((cin, _PAD), jnp.float32)
        ext = jnp.concatenate([zpad, a, zpad], axis=1)    # lane-aligned concat
        acc = jnp.zeros((cout, S), jnp.float32)
        for k in range(9):                                # static unroll
            dy, dx = k // 3 - 1, k % 3 - 1
            off = dy * W + dx
            tap = ext[:, _PAD + off:_PAD + off + S]       # static lane-offset slice
            if dx == -1:
                tap = tap * m_left                        # kill cross-row wrap at w == 0
            elif dx == 1:
                tap = tap * m_right                       # kill cross-row wrap at w == W-1
            acc = acc + jnp.dot(w_ref[k], tap.astype(jnp.bfloat16),
                                preferred_element_type=jnp.float32)
        return acc + b_ref[...]

    x = x_ref[0]                                                    # (4, S) f32
    # Layer 1+2: vertex conv and guidance conv as one block-diagonal conv; the
    # output keeps [v ; g] stacked on sublanes so no concat is ever needed.
    vg = jnp.maximum(conv9(x, w1_ref, b1_ref), 0.0)                 # (2C, S)
    f = jnp.maximum(conv9(vg, wf_ref, bf_ref), 0.0)                 # (C, S)
    n = conv9(f, wo_ref, bo_ref)                                    # (3, S)

    # Unit-normal output: explicit 3-term sum over sublane-resident channels.
    nx, ny, nz = n[0:1], n[1:2], n[2:3]
    inv = jax.lax.rsqrt(nx * nx + ny * ny + nz * nz + 1e-12)
    o_ref[0] = n * inv                                              # (3, S) lane-dense store


# -----------------------------------------------------------------------------
# Public wrapper (PyTorch-style NCHW in / NCHW out)
# -----------------------------------------------------------------------------
@jax.jit
def cnn_forward(kp, x_nchw):
    N, Cin, H, W = x_nchw.shape
    assert Cin == 4, "expects 3 vertex channels + 1 image channel"
    assert W + 1 <= _PAD
    S = H * W
    C2 = kp["w1"].shape[1]            # 2 * channel_num
    C = kp["wf"].shape[1]             # channel_num
    x_flat = x_nchw.reshape(N, Cin, S).astype(jnp.float32)   # free reshape, no pad/transpose

    kern = functools.partial(_ng_fused_kernel, S=S, W=W)
    out = pl.pallas_call(
        kern,
        out_shape=jax.ShapeDtypeStruct((N, 3, S), jnp.float32),
        grid_spec=pltpu.PrefetchScalarGridSpec(
            num_scalar_prefetch=0,
            grid=(N,),                                        # batch-parallel (v7x: 2 TCs)
            in_specs=[
                pl.BlockSpec((1, 4, S), lambda n: (n, 0, 0)),        # x
                pl.BlockSpec((2, 1, S), lambda n: (0, 0, 0)),        # dx boundary masks
                pl.BlockSpec((9, C2, 4), lambda n: (0, 0, 0)),       # w1 (blockdiag wv|wg)
                pl.BlockSpec((C2, 1), lambda n: (0, 0)),             # b1
                pl.BlockSpec((9, C, C2), lambda n: (0, 0, 0)),       # wf
                pl.BlockSpec((C, 1), lambda n: (0, 0)),              # bf
                pl.BlockSpec((9, 3, C), lambda n: (0, 0, 0)),        # wo
                pl.BlockSpec((3, 1), lambda n: (0, 0)),              # bo
            ],
            out_specs=pl.BlockSpec((1, 3, S), lambda n: (n, 0, 0)),
        ),
        compiler_params=pltpu.CompilerParams(
            dimension_semantics=("parallel",)),
    )(x_flat, kp["masks"], kp["w1"], kp["b1"], kp["wf"], kp["bf"],
      kp["wo"], kp["bo"])

    return out.reshape(N, 3, H, W)


# -----------------------------------------------------------------------------
# Pure-JAX f32 reference (same network) for a numerical sanity check.
# -----------------------------------------------------------------------------
def _conv_ref(x, w, b):
    y = jax.lax.conv_general_dilated(
        x, w, window_strides=(1, 1), padding=((1, 1), (1, 1)),
        dimension_numbers=("NCHW", "OIHW", "NCHW"))
    return y + b.reshape(1, -1, 1, 1)


def cnn_forward_ref(p, x):
    xv, xi = x[:, :3], x[:, 3:4]
    v = jax.nn.relu(_conv_ref(xv, p["wv"], p["bv"]))
    g = jax.nn.relu(_conv_ref(xi, p["wg"], p["bg"]))
    f = jax.nn.relu(_conv_ref(jnp.concatenate([v, g], axis=1), p["wf"], p["bf"]))
    n = _conv_ref(f, p["wo"], p["bo"])
    inv = jax.lax.rsqrt(jnp.sum(n * n, axis=1, keepdims=True) + 1e-12)
    return n * inv


if __name__ == "__main__":
    key = jax.random.PRNGKey(0)
    k_param, k_x = jax.random.split(key)

    channel_num = 8
    N, C_in, H, W = 2, 4, 16, 16

    params = init_params(channel_num, k_param)
    x = jax.random.normal(k_x, (N, C_in, H, W), jnp.float32)

    kparams = pack_params(params, H, W)
    out = jax.block_until_ready(cnn_forward(kparams, x))

    assert out.shape == (N, 3, H, W), out.shape
    assert bool(jnp.all(jnp.isfinite(out)))

    # Loose check vs. the f32 reference (kernel uses bf16 MXU inputs).
    ref = cnn_forward_ref(params, x)
    mean_err = float(jnp.mean(jnp.abs(out - ref)))
    assert mean_err < 3e-2, mean_err

    print("KERNEL_OK")
</pallas_src>

<mosaic_0001>
module attributes {stable_mosaic.version = 11 : i64} {
  func.func @_ng_fused_kernel(%arg0: i32, %arg1: memref<1x4x256xf32, #tpu.memory_space<vmem>>, %arg2: memref<2x1x256xf32, #tpu.memory_space<vmem>>, %arg3: memref<9x16x4xbf16, #tpu.memory_space<vmem>>, %arg4: memref<16x1xf32, #tpu.memory_space<vmem>>, %arg5: memref<9x8x16xbf16, #tpu.memory_space<vmem>>, %arg6: memref<8x1xf32, #tpu.memory_space<vmem>>, %arg7: memref<9x3x8xbf16, #tpu.memory_space<vmem>>, %arg8: memref<3x1xf32, #tpu.memory_space<vmem>>, %arg9: memref<1x3x256xf32, #tpu.memory_space<vmem>>) attributes {dimension_semantics = [#tpu.dimension_semantics<parallel>], iteration_bounds = array<i64: 2>, scalar_prefetch = 0 : i64, scratch_operands = 0 : i64, tpu.core_type = #tpu.core_type<tc>, window_params = [{transform_indices = @transform_0, window_bounds = array<i64: 1, 4, 256>}, {pipeline_mode = #tpu.pipeline_mode<synchronous>, transform_indices = @transform_1, window_bounds = array<i64: 2, 1, 256>}, {pipeline_mode = #tpu.pipeline_mode<synchronous>, transform_indices = @transform_2, window_bounds = array<i64: 9, 16, 4>}, {pipeline_mode = #tpu.pipeline_mode<synchronous>, transform_indices = @transform_3, window_bounds = array<i64: 16, 1>}, {pipeline_mode = #tpu.pipeline_mode<synchronous>, transform_indices = @transform_4, window_bounds = array<i64: 9, 8, 16>}, {pipeline_mode = #tpu.pipeline_mode<synchronous>, transform_indices = @transform_5, window_bounds = array<i64: 8, 1>}, {pipeline_mode = #tpu.pipeline_mode<synchronous>, transform_indices = @transform_6, window_bounds = array<i64: 9, 3, 8>}, {pipeline_mode = #tpu.pipeline_mode<synchronous>, transform_indices = @transform_7, window_bounds = array<i64: 3, 1>}, {transform_indices = @transform_8, window_bounds = array<i64: 1, 3, 256>}]} {
    %c0 = arith.constant 0 : index
    %c0_0 = arith.constant 0 : index
    %c0_1 = arith.constant 0 : index
    %0 = vector.load %arg2[%c0, %c0_0, %c0_1] : memref<2x1x256xf32, #tpu.memory_space<vmem>>, vector<1x1x256xf32>
    %1 = vector.shape_cast %0 : vector<1x1x256xf32> to vector<1x256xf32>
    %c1 = arith.constant 1 : index
    %c0_2 = arith.constant 0 : index
    %c0_3 = arith.constant 0 : index
    %2 = vector.load %arg2[%c1, %c0_2, %c0_3] : memref<2x1x256xf32, #tpu.memory_space<vmem>>, vector<1x1x256xf32>
    %3 = vector.shape_cast %2 : vector<1x1x256xf32> to vector<1x256xf32>
    %c0_4 = arith.constant 0 : index
    %c0_5 = arith.constant 0 : index
    %c0_6 = arith.constant 0 : index
    %4 = vector.load %arg1[%c0_4, %c0_5, %c0_6] : memref<1x4x256xf32, #tpu.memory_space<vmem>>, vector<1x4x256xf32>
    %5 = vector.shape_cast %4 : vector<1x4x256xf32> to vector<4x256xf32>
    %cst = arith.constant 0.000000e+00 : f32
    %6 = vector.broadcast %cst : f32 to vector<4x128xf32>
    %7 = tpu.concatenate %6, %5, %6 in 1 : vector<4x128xf32>, vector<4x256xf32>, vector<4x128xf32> -> vector<4x512xf32>
    %cst_7 = arith.constant 0.000000e+00 : f32
    %8 = vector.broadcast %cst_7 : f32 to vector<16x256xf32>
    %9 = vector.extract_strided_slice %7 {offsets = [0, 111], sizes = [4, 256], strides = [1, 1]} : vector<4x512xf32> to vector<4x256xf32>
    %10 = vector.broadcast %1 : vector<1x256xf32> to vector<4x256xf32>
    %11 = arith.mulf %9, %10 : vector<4x256xf32>
    %c0_8 = arith.constant 0 : index
    %c0_9 = arith.constant 0 : index
    %c0_10 = arith.constant 0 : index
    %12 = vector.load %arg3[%c0_8, %c0_9, %c0_10] : memref<9x16x4xbf16, #tpu.memory_space<vmem>>, vector<1x16x4xbf16>
    %13 = vector.shape_cast %12 : vector<1x16x4xbf16> to vector<16x4xbf16>
    %14 = arith.truncf %11 : vector<4x256xf32> to vector<4x256xbf16>
    %cst_11 = arith.constant dense<0.000000e+00> : vector<16x256xf32>
    %15 = tpu.matmul %13, %14, %cst_11 {dimension_numbers = #tpu.dot_dimension_numbers<[1], [0], [0], [1], [0, 0, 1, 1], [], []>} : vector<16x4xbf16>, vector<4x256xbf16>, vector<16x256xf32> -> vector<16x256xf32>
    %16 = arith.addf %8, %15 : vector<16x256xf32>
    %17 = vector.extract_strided_slice %7 {offsets = [0, 112], sizes = [4, 256], strides = [1, 1]} : vector<4x512xf32> to vector<4x256xf32>
    %c1_12 = arith.constant 1 : index
    %c0_13 = arith.constant 0 : index
    %c0_14 = arith.constant 0 : index
    %18 = vector.load %arg3[%c1_12, %c0_13, %c0_14] : memref<9x16x4xbf16, #tpu.memory_space<vmem>>, vector<1x16x4xbf16>
    %19 = vector.shape_cast %18 : vector<1x16x4xbf16> to vector<16x4xbf16>
    %20 = arith.truncf %17 : vector<4x256xf32> to vector<4x256xbf16>
    %cst_15 = arith.constant dense<0.000000e+00> : vector<16x256xf32>
    %21 = tpu.matmul %19, %20, %cst_15 {dimension_numbers = #tpu.dot_dimension_numbers<[1], [0], [0], [1], [0, 0, 1, 1], [], []>} : vector<16x4xbf16>, vector<4x256xbf16>, vector<16x256xf32> -> vector<16x256xf32>
    %22 = arith.addf %16, %21 : vector<16x256xf32>
    %23 = vector.extract_strided_slice %7 {offsets = [0, 113], sizes = [4, 256], strides = [1, 1]} : vector<4x512xf32> to vector<4x256xf32>
    %24 = vector.broadcast %3 : vector<1x256xf32> to vector<4x256xf32>
    %25 = arith.mulf %23, %24 : vector<4x256xf32>
    %c2 = arith.constant 2 : index
    %c0_16 = arith.constant 0 : index
    %c0_17 = arith.constant 0 : index
    %26 = vector.load %arg3[%c2, %c0_16, %c0_17] : memref<9x16x4xbf16, #tpu.memory_space<vmem>>, vector<1x16x4xbf16>
    %27 = vector.shape_cast %26 : vector<1x16x4xbf16> to vector<16x4xbf16>
    %28 = arith.truncf %25 : vector<4x256xf32> to vector<4x256xbf16>
    %cst_18 = arith.constant dense<0.000000e+00> : vector<16x256xf32>
    %29 = tpu.matmul %27, %28, %cst_18 {dimension_numbers = #tpu.dot_dimension_numbers<[1], [0], [0], [1], [0, 0, 1, 1], [], []>} : vector<16x4xbf16>, vector<4x256xbf16>, vector<16x256xf32> -> vector<16x256xf32>
    %30 = arith.addf %22, %29 : vector<16x256xf32>
    %31 = vector.extract_strided_slice %7 {offsets = [0, 127], sizes = [4, 256], strides = [1, 1]} : vector<4x512xf32> to vector<4x256xf32>
    %32 = vector.broadcast %1 : vector<1x256xf32> to vector<4x256xf32>
    %33 = arith.mulf %31, %32 : vector<4x256xf32>
    %c3 = arith.constant 3 : index
    %c0_19 = arith.constant 0 : index
    %c0_20 = arith.constant 0 : index
    %34 = vector.load %arg3[%c3, %c0_19, %c0_20] : memref<9x16x4xbf16, #tpu.memory_space<vmem>>, vector<1x16x4xbf16>
    %35 = vector.shape_cast %34 : vector<1x16x4xbf16> to vector<16x4xbf16>
    %36 = arith.truncf %33 : vector<4x256xf32> to vector<4x256xbf16>
    %cst_21 = arith.constant dense<0.000000e+00> : vector<16x256xf32>
    %37 = tpu.matmul %35, %36, %cst_21 {dimension_numbers = #tpu.dot_dimension_numbers<[1], [0], [0], [1], [0, 0, 1, 1], [], []>} : vector<16x4xbf16>, vector<4x256xbf16>, vector<16x256xf32> -> vector<16x256xf32>
    %38 = arith.addf %30, %37 : vector<16x256xf32>
    %39 = vector.extract_strided_slice %7 {offsets = [0, 128], sizes = [4, 256], strides = [1, 1]} : vector<4x512xf32> to vector<4x256xf32>
    %c4 = arith.constant 4 : index
    %c0_22 = arith.constant 0 : index
    %c0_23 = arith.constant 0 : index
    %40 = vector.load %arg3[%c4, %c0_22, %c0_23] : memref<9x16x4xbf16, #tpu.memory_space<vmem>>, vector<1x16x4xbf16>
    %41 = vector.shape_cast %40 : vector<1x16x4xbf16> to vector<16x4xbf16>
    %42 = arith.truncf %39 : vector<4x256xf32> to vector<4x256xbf16>
    %cst_24 = arith.constant dense<0.000000e+00> : vector<16x256xf32>
    %43 = tpu.matmul %41, %42, %cst_24 {dimension_numbers = #tpu.dot_dimension_numbers<[1], [0], [0], [1], [0, 0, 1, 1], [], []>} : vector<16x4xbf16>, vector<4x256xbf16>, vector<16x256xf32> -> vector<16x256xf32>
    %44 = arith.addf %38, %43 : vector<16x256xf32>
    %45 = vector.extract_strided_slice %7 {offsets = [0, 129], sizes = [4, 256], strides = [1, 1]} : vector<4x512xf32> to vector<4x256xf32>
    %46 = vector.broadcast %3 : vector<1x256xf32> to vector<4x256xf32>
    %47 = arith.mulf %45, %46 : vector<4x256xf32>
    %c5 = arith.constant 5 : index
    %c0_25 = arith.constant 0 : index
    %c0_26 = arith.constant 0 : index
    %48 = vector.load %arg3[%c5, %c0_25, %c0_26] : memref<9x16x4xbf16, #tpu.memory_space<vmem>>, vector<1x16x4xbf16>
    %49 = vector.shape_cast %48 : vector<1x16x4xbf16> to vector<16x4xbf16>
    %50 = arith.truncf %47 : vector<4x256xf32> to vector<4x256xbf16>
    %cst_27 = arith.constant dense<0.000000e+00> : vector<16x256xf32>
    %51 = tpu.matmul %49, %50, %cst_27 {dimension_numbers = #tpu.dot_dimension_numbers<[1], [0], [0], [1], [0, 0, 1, 1], [], []>} : vector<16x4xbf16>, vector<4x256xbf16>, vector<16x256xf32> -> vector<16x256xf32>
    %52 = arith.addf %44, %51 : vector<16x256xf32>
    %53 = vector.extract_strided_slice %7 {offsets = [0, 143], sizes = [4, 256], strides = [1, 1]} : vector<4x512xf32> to vector<4x256xf32>
    %54 = vector.broadcast %1 : vector<1x256xf32> to vector<4x256xf32>
    %55 = arith.mulf %53, %54 : vector<4x256xf32>
    %c6 = arith.constant 6 : index
    %c0_28 = arith.constant 0 : index
    %c0_29 = arith.constant 0 : index
    %56 = vector.load %arg3[%c6, %c0_28, %c0_29] : memref<9x16x4xbf16, #tpu.memory_space<vmem>>, vector<1x16x4xbf16>
    %57 = vector.shape_cast %56 : vector<1x16x4xbf16> to vector<16x4xbf16>
    %58 = arith.truncf %55 : vector<4x256xf32> to vector<4x256xbf16>
    %cst_30 = arith.constant dense<0.000000e+00> : vector<16x256xf32>
    %59 = tpu.matmul %57, %58, %cst_30 {dimension_numbers = #tpu.dot_dimension_numbers<[1], [0], [0], [1], [0, 0, 1, 1], [], []>} : vector<16x4xbf16>, vector<4x256xbf16>, vector<16x256xf32> -> vector<16x256xf32>
    %60 = arith.addf %52, %59 : vector<16x256xf32>
    %61 = vector.extract_strided_slice %7 {offsets = [0, 144], sizes = [4, 256], strides = [1, 1]} : vector<4x512xf32> to vector<4x256xf32>
    %c7 = arith.constant 7 : index
    %c0_31 = arith.constant 0 : index
    %c0_32 = arith.constant 0 : index
    %62 = vector.load %arg3[%c7, %c0_31, %c0_32] : memref<9x16x4xbf16, #tpu.memory_space<vmem>>, vector<1x16x4xbf16>
    %63 = vector.shape_cast %62 : vector<1x16x4xbf16> to vector<16x4xbf16>
    %64 = arith.truncf %61 : vector<4x256xf32> to vector<4x256xbf16>
    %cst_33 = arith.constant dense<0.000000e+00> : vector<16x256xf32>
    %65 = tpu.matmul %63, %64, %cst_33 {dimension_numbers = #tpu.dot_dimension_numbers<[1], [0], [0], [1], [0, 0, 1, 1], [], []>} : vector<16x4xbf16>, vector<4x256xbf16>, vector<16x256xf32> -> vector<16x256xf32>
    %66 = arith.addf %60, %65 : vector<16x256xf32>
    %67 = vector.extract_strided_slice %7 {offsets = [0, 145], sizes = [4, 256], strides = [1, 1]} : vector<4x512xf32> to vector<4x256xf32>
    %68 = vector.broadcast %3 : vector<1x256xf32> to vector<4x256xf32>
    %69 = arith.mulf %67, %68 : vector<4x256xf32>
    %c8 = arith.constant 8 : index
    %c0_34 = arith.constant 0 : index
    %c0_35 = arith.constant 0 : index
    %70 = vector.load %arg3[%c8, %c0_34, %c0_35] : memref<9x16x4xbf16, #tpu.memory_space<vmem>>, vector<1x16x4xbf16>
    %71 = vector.shape_cast %70 : vector<1x16x4xbf16> to vector<16x4xbf16>
    %72 = arith.truncf %69 : vector<4x256xf32> to vector<4x256xbf16>
    %cst_36 = arith.constant dense<0.000000e+00> : vector<16x256xf32>
    %73 = tpu.matmul %71, %72, %cst_36 {dimension_numbers = #tpu.dot_dimension_numbers<[1], [0], [0], [1], [0, 0, 1, 1], [], []>} : vector<16x4xbf16>, vector<4x256xbf16>, vector<16x256xf32> -> vector<16x256xf32>
    %74 = arith.addf %66, %73 : vector<16x256xf32>
    %c0_37 = arith.constant 0 : index
    %c0_38 = arith.constant 0 : index
    %75 = vector.load %arg4[%c0_37, %c0_38] : memref<16x1xf32, #tpu.memory_space<vmem>>, vector<16x1xf32>
    %76 = vector.broadcast %75 : vector<16x1xf32> to vector<16x256xf32>
    %77 = arith.addf %74, %76 : vector<16x256xf32>
    %cst_39 = arith.constant 0.000000e+00 : f32
    %78 = vector.broadcast %cst_39 : f32 to vector<16x256xf32>
    %79 = arith.maximumf %77, %78 : vector<16x256xf32>
    %cst_40 = arith.constant 0.000000e+00 : f32
    %80 = vector.broadcast %cst_40 : f32 to vector<16x128xf32>
    %81 = tpu.concatenate %80, %79, %80 in 1 : vector<16x128xf32>, vector<16x256xf32>, vector<16x128xf32> -> vector<16x512xf32>
    %cst_41 = arith.constant 0.000000e+00 : f32
    %82 = vector.broadcast %cst_41 : f32 to vector<8x256xf32>
    %83 = vector.extract_strided_slice %81 {offsets = [0, 111], sizes = [16, 256], strides = [1, 1]} : vector<16x512xf32> to vector<16x256xf32>
    %84 = vector.broadcast %1 : vector<1x256xf32> to vector<16x256xf32>
    %85 = arith.mulf %83, %84 : vector<16x256xf32>
    %c0_42 = arith.constant 0 : index
    %c0_43 = arith.constant 0 : index
    %c0_44 = arith.constant 0 : index
    %86 = vector.load %arg5[%c0_42, %c0_43, %c0_44] : memref<9x8x16xbf16, #tpu.memory_space<vmem>>, vector<1x8x16xbf16>
    %87 = vector.shape_cast %86 : vector<1x8x16xbf16> to vector<8x16xbf16>
    %88 = arith.truncf %85 : vector<16x256xf32> to vector<16x256xbf16>
    %cst_45 = arith.constant dense<0.000000e+00> : vector<8x256xf32>
    %89 = tpu.matmul %87, %88, %cst_45 {dimension_numbers = #tpu.dot_dimension_numbers<[1], [0], [0], [1], [0, 0, 1, 1], [], []>} : vector<8x16xbf16>, vector<16x256xbf16>, vector<8x256xf32> -> vector<8x256xf32>
    %90 = arith.addf %82, %89 : vector<8x256xf32>
    %91 = vector.extract_strided_slice %81 {offsets = [0, 112], sizes = [16, 256], strides = [1, 1]} : vector<16x512xf32> to vector<16x256xf32>
    %c1_46 = arith.constant 1 : index
    %c0_47 = arith.constant 0 : index
    %c0_48 = arith.constant 0 : index
    %92 = vector.load %arg5[%c1_46, %c0_47, %c0_48] : memref<9x8x16xbf16, #tpu.memory_space<vmem>>, vector<1x8x16xbf16>
    %93 = vector.shape_cast %92 : vector<1x8x16xbf16> to vector<8x16xbf16>
    %94 = arith.truncf %91 : vector<16x256xf32> to vector<16x256xbf16>
    %cst_49 = arith.constant dense<0.000000e+00> : vector<8x256xf32>
    %95 = tpu.matmul %93, %94, %cst_49 {dimension_numbers = #tpu.dot_dimension_numbers<[1], [0], [0], [1], [0, 0, 1, 1], [], []>} : vector<8x16xbf16>, vector<16x256xbf16>, vector<8x256xf32> -> vector<8x256xf32>
    %96 = arith.addf %90, %95 : vector<8x256xf32>
    %97 = vector.extract_strided_slice %81 {offsets = [0, 113], sizes = [16, 256], strides = [1, 1]} : vector<16x512xf32> to vector<16x256xf32>
    %98 = vector.broadcast %3 : vector<1x256xf32> to vector<16x256xf32>
    %99 = arith.mulf %97, %98 : vector<16x256xf32>
    %c2_50 = arith.constant 2 : index
    %c0_51 = arith.constant 0 : index
    %c0_52 = arith.constant 0 : index
    %100 = vector.load %arg5[%c2_50, %c0_51, %c0_52] : memref<9x8x16xbf16, #tpu.memory_space<vmem>>, vector<1x8x16xbf16>
    %101 = vector.shape_cast %100 : vector<1x8x16xbf16> to vector<8x16xbf16>
    %102 = arith.truncf %99 : vector<16x256xf32> to vector<16x256xbf16>
    %cst_53 = arith.constant dense<0.000000e+00> : vector<8x256xf32>
    %103 = tpu.matmul %101, %102, %cst_53 {dimension_numbers = #tpu.dot_dimension_numbers<[1], [0], [0], [1], [0, 0, 1, 1], [], []>} : vector<8x16xbf16>, vector<16x256xbf16>, vector<8x256xf32> -> vector<8x256xf32>
    %104 = arith.addf %96, %103 : vector<8x256xf32>
    %105 = vector.extract_strided_slice %81 {offsets = [0, 127], sizes = [16, 256], strides = [1, 1]} : vector<16x512xf32> to vector<16x256xf32>
    %106 = vector.broadcast %1 : vector<1x256xf32> to vector<16x256xf32>
    %107 = arith.mulf %105, %106 : vector<16x256xf32>
    %c3_54 = arith.constant 3 : index
    %c0_55 = arith.constant 0 : index
    %c0_56 = arith.constant 0 : index
    %108 = vector.load %arg5[%c3_54, %c0_55, %c0_56] : memref<9x8x16xbf16, #tpu.memory_space<vmem>>, vector<1x8x16xbf16>
    %109 = vector.shape_cast %108 : vector<1x8x16xbf16> to vector<8x16xbf16>
    %110 = arith.truncf %107 : vector<16x256xf32> to vector<16x256xbf16>
    %cst_57 = arith.constant dense<0.000000e+00> : vector<8x256xf32>
    %111 = tpu.matmul %109, %110, %cst_57 {dimension_numbers = #tpu.dot_dimension_numbers<[1], [0], [0], [1], [0, 0, 1, 1], [], []>} : vector<8x16xbf16>, vector<16x256xbf16>, vector<8x256xf32> -> vector<8x256xf32>
    %112 = arith.addf %104, %111 : vector<8x256xf32>
    %113 = vector.extract_strided_slice %81 {offsets = [0, 128], sizes = [16, 256], strides = [1, 1]} : vector<16x512xf32> to vector<16x256xf32>
    %c4_58 = arith.constant 4 : index
    %c0_59 = arith.constant 0 : index
    %c0_60 = arith.constant 0 : index
    %114 = vector.load %arg5[%c4_58, %c0_59, %c0_60] : memref<9x8x16xbf16, #tpu.memory_space<vmem>>, vector<1x8x16xbf16>
    %115 = vector.shape_cast %114 : vector<1x8x16xbf16> to vector<8x16xbf16>
    %116 = arith.truncf %113 : vector<16x256xf32> to vector<16x256xbf16>
    %cst_61 = arith.constant dense<0.000000e+00> : vector<8x256xf32>
    %117 = tpu.matmul %115, %116, %cst_61 {dimension_numbers = #tpu.dot_dimension_numbers<[1], [0], [0], [1], [0, 0, 1, 1], [], []>} : vector<8x16xbf16>, vector<16x256xbf16>, vector<8x256xf32> -> vector<8x256xf32>
    %118 = arith.addf %112, %117 : vector<8x256xf32>
    %119 = vector.extract_strided_slice %81 {offsets = [0, 129], sizes = [16, 256], strides = [1, 1]} : vector<16x512xf32> to vector<16x256xf32>
    %120 = vector.broadcast %3 : vector<1x256xf32> to vector<16x256xf32>
    %121 = arith.mulf %119, %120 : vector<16x256xf32>
    %c5_62 = arith.constant 5 : index
    %c0_63 = arith.constant 0 : index
    %c0_64 = arith.constant 0 : index
    %122 = vector.load %arg5[%c5_62, %c0_63, %c0_64] : memref<9x8x16xbf16, #tpu.memory_space<vmem>>, vector<1x8x16xbf16>
    %123 = vector.shape_cast %122 : vector<1x8x16xbf16> to vector<8x16xbf16>
    %124 = arith.truncf %121 : vector<16x256xf32> to vector<16x256xbf16>
    %cst_65 = arith.constant dense<0.000000e+00> : vector<8x256xf32>
    %125 = tpu.matmul %123, %124, %cst_65 {dimension_numbers = #tpu.dot_dimension_numbers<[1], [0], [0], [1], [0, 0, 1, 1], [], []>} : vector<8x16xbf16>, vector<16x256xbf16>, vector<8x256xf32> -> vector<8x256xf32>
    %126 = arith.addf %118, %125 : vector<8x256xf32>
    %127 = vector.extract_strided_slice %81 {offsets = [0, 143], sizes = [16, 256], strides = [1, 1]} : vector<16x512xf32> to vector<16x256xf32>
    %128 = vector.broadcast %1 : vector<1x256xf32> to vector<16x256xf32>
    %129 = arith.mulf %127, %128 : vector<16x256xf32>
    %c6_66 = arith.constant 6 : index
    %c0_67 = arith.constant 0 : index
    %c0_68 = arith.constant 0 : index
    %130 = vector.load %arg5[%c6_66, %c0_67, %c0_68] : memref<9x8x16xbf16, #tpu.memory_space<vmem>>, vector<1x8x16xbf16>
    %131 = vector.shape_cast %130 : vector<1x8x16xbf16> to vector<8x16xbf16>
    %132 = arith.truncf %129 : vector<16x256xf32> to vector<16x256xbf16>
    %cst_69 = arith.constant dense<0.000000e+00> : vector<8x256xf32>
    %133 = tpu.matmul %131, %132, %cst_69 {dimension_numbers = #tpu.dot_dimension_numbers<[1], [0], [0], [1], [0, 0, 1, 1], [], []>} : vector<8x16xbf16>, vector<16x256xbf16>, vector<8x256xf32> -> vector<8x256xf32>
    %134 = arith.addf %126, %133 : vector<8x256xf32>
    %135 = vector.extract_strided_slice %81 {offsets = [0, 144], sizes = [16, 256], strides = [1, 1]} : vector<16x512xf32> to vector<16x256xf32>
    %c7_70 = arith.constant 7 : index
    %c0_71 = arith.constant 0 : index
    %c0_72 = arith.constant 0 : index
    %136 = vector.load %arg5[%c7_70, %c0_71, %c0_72] : memref<9x8x16xbf16, #tpu.memory_space<vmem>>, vector<1x8x16xbf16>
    %137 = vector.shape_cast %136 : vector<1x8x16xbf16> to vector<8x16xbf16>
    %138 = arith.truncf %135 : vector<16x256xf32> to vector<16x256xbf16>
    %cst_73 = arith.constant dense<0.000000e+00> : vector<8x256xf32>
    %139 = tpu.matmul %137, %138, %cst_73 {dimension_numbers = #tpu.dot_dimension_numbers<[1], [0], [0], [1], [0, 0, 1, 1], [], []>} : vector<8x16xbf16>, vector<16x256xbf16>, vector<8x256xf32> -> vector<8x256xf32>
    %140 = arith.addf %134, %139 : vector<8x256xf32>
    %141 = vector.extract_strided_slice %81 {offsets = [0, 145], sizes = [16, 256], strides = [1, 1]} : vector<16x512xf32> to vector<16x256xf32>
    %142 = vector.broadcast %3 : vector<1x256xf32> to vector<16x256xf32>
    %143 = arith.mulf %141, %142 : vector<16x256xf32>
    %c8_74 = arith.constant 8 : index
    %c0_75 = arith.constant 0 : index
    %c0_76 = arith.constant 0 : index
    %144 = vector.load %arg5[%c8_74, %c0_75, %c0_76] : memref<9x8x16xbf16, #tpu.memory_space<vmem>>, vector<1x8x16xbf16>
    %145 = vector.shape_cast %144 : vector<1x8x16xbf16> to vector<8x16xbf16>
    %146 = arith.truncf %143 : vector<16x256xf32> to vector<16x256xbf16>
    %cst_77 = arith.constant dense<0.000000e+00> : vector<8x256xf32>
    %147 = tpu.matmul %145, %146, %cst_77 {dimension_numbers = #tpu.dot_dimension_numbers<[1], [0], [0], [1], [0, 0, 1, 1], [], []>} : vector<8x16xbf16>, vector<16x256xbf16>, vector<8x256xf32> -> vector<8x256xf32>
    %148 = arith.addf %140, %147 : vector<8x256xf32>
    %c0_78 = arith.constant 0 : index
    %c0_79 = arith.constant 0 : index
    %149 = vector.load %arg6[%c0_78, %c0_79] : memref<8x1xf32, #tpu.memory_space<vmem>>, vector<8x1xf32>
    %150 = vector.broadcast %149 : vector<8x1xf32> to vector<8x256xf32>
    %151 = arith.addf %148, %150 : vector<8x256xf32>
    %cst_80 = arith.constant 0.000000e+00 : f32
    %152 = vector.broadcast %cst_80 : f32 to vector<8x256xf32>
    %153 = arith.maximumf %151, %152 : vector<8x256xf32>
    %cst_81 = arith.constant 0.000000e+00 : f32
    %154 = vector.broadcast %cst_81 : f32 to vector<8x128xf32>
    %155 = tpu.concatenate %154, %153, %154 in 1 : vector<8x128xf32>, vector<8x256xf32>, vector<8x128xf32> -> vector<8x512xf32>
    %cst_82 = arith.constant 0.000000e+00 : f32
    %156 = vector.broadcast %cst_82 : f32 to vector<3x256xf32>
    %157 = vector.extract_strided_slice %155 {offsets = [0, 111], sizes = [8, 256], strides = [1, 1]} : vector<8x512xf32> to vector<8x256xf32>
    %158 = vector.broadcast %1 : vector<1x256xf32> to vector<8x256xf32>
    %159 = arith.mulf %157, %158 : vector<8x256xf32>
    %c0_83 = arith.constant 0 : index
    %c0_84 = arith.constant 0 : index
    %c0_85 = arith.constant 0 : index
    %160 = vector.load %arg7[%c0_83, %c0_84, %c0_85] : memref<9x3x8xbf16, #tpu.memory_space<vmem>>, vector<1x3x8xbf16>
    %161 = vector.shape_cast %160 : vector<1x3x8xbf16> to vector<3x8xbf16>
    %162 = arith.truncf %159 : vector<8x256xf32> to vector<8x256xbf16>
    %cst_86 = arith.constant dense<0.000000e+00> : vector<3x256xf32>
    %163 = tpu.matmul %161, %162, %cst_86 {dimension_numbers = #tpu.dot_dimension_numbers<[1], [0], [0], [1], [0, 0, 1, 1], [], []>} : vector<3x8xbf16>, vector<8x256xbf16>, vector<3x256xf32> -> vector<3x256xf32>
    %164 = arith.addf %156, %163 : vector<3x256xf32>
    %165 = vector.extract_strided_slice %155 {offsets = [0, 112], sizes = [8, 256], strides = [1, 1]} : vector<8x512xf32> to vector<8x256xf32>
    %c1_87 = arith.constant 1 : index
    %c0_88 = arith.constant 0 : index
    %c0_89 = arith.constant 0 : index
    %166 = vector.load %arg7[%c1_87, %c0_88, %c0_89] : memref<9x3x8xbf16, #tpu.memory_space<vmem>>, vector<1x3x8xbf16>
    %167 = vector.shape_cast %166 : vector<1x3x8xbf16> to vector<3x8xbf16>
    %168 = arith.truncf %165 : vector<8x256xf32> to vector<8x256xbf16>
    %cst_90 = arith.constant dense<0.000000e+00> : vector<3x256xf32>
    %169 = tpu.matmul %167, %168, %cst_90 {dimension_numbers = #tpu.dot_dimension_numbers<[1], [0], [0], [1], [0, 0, 1, 1], [], []>} : vector<3x8xbf16>, vector<8x256xbf16>, vector<3x256xf32> -> vector<3x256xf32>
    %170 = arith.addf %164, %169 : vector<3x256xf32>
    %171 = vector.extract_strided_slice %155 {offsets = [0, 113], sizes = [8, 256], strides = [1, 1]} : vector<8x512xf32> to vector<8x256xf32>
    %172 = vector.broadcast %3 : vector<1x256xf32> to vector<8x256xf32>
    %173 = arith.mulf %171, %172 : vector<8x256xf32>
    %c2_91 = arith.constant 2 : index
    %c0_92 = arith.constant 0 : index
    %c0_93 = arith.constant 0 : index
    %174 = vector.load %arg7[%c2_91, %c0_92, %c0_93] : memref<9x3x8xbf16, #tpu.memory_space<vmem>>, vector<1x3x8xbf16>
    %175 = vector.shape_cast %174 : vector<1x3x8xbf16> to vector<3x8xbf16>
    %176 = arith.truncf %173 : vector<8x256xf32> to vector<8x256xbf16>
    %cst_94 = arith.constant dense<0.000000e+00> : vector<3x256xf32>
    %177 = tpu.matmul %175, %176, %cst_94 {dimension_numbers = #tpu.dot_dimension_numbers<[1], [0], [0], [1], [0, 0, 1, 1], [], []>} : vector<3x8xbf16>, vector<8x256xbf16>, vector<3x256xf32> -> vector<3x256xf32>
    %178 = arith.addf %170, %177 : vector<3x256xf32>
    %179 = vector.extract_strided_slice %155 {offsets = [0, 127], sizes = [8, 256], strides = [1, 1]} : vector<8x512xf32> to vector<8x256xf32>
    %180 = vector.broadcast %1 : vector<1x256xf32> to vector<8x256xf32>
    %181 = arith.mulf %179, %180 : vector<8x256xf32>
    %c3_95 = arith.constant 3 : index
    %c0_96 = arith.constant 0 : index
    %c0_97 = arith.constant 0 : index
    %182 = vector.load %arg7[%c3_95, %c0_96, %c0_97] : memref<9x3x8xbf16, #tpu.memory_space<vmem>>, vector<1x3x8xbf16>
    %183 = vector.shape_cast %182 : vector<1x3x8xbf16> to vector<3x8xbf16>
    %184 = arith.truncf %181 : vector<8x256xf32> to vector<8x256xbf16>
    %cst_98 = arith.constant dense<0.000000e+00> : vector<3x256xf32>
    %185 = tpu.matmul %183, %184, %cst_98 {dimension_numbers = #tpu.dot_dimension_numbers<[1], [0], [0], [1], [0, 0, 1, 1], [], []>} : vector<3x8xbf16>, vector<8x256xbf16>, vector<3x256xf32> -> vector<3x256xf32>
    %186 = arith.addf %178, %185 : vector<3x256xf32>
    %187 = vector.extract_strided_slice %155 {offsets = [0, 128], sizes = [8, 256], strides = [1, 1]} : vector<8x512xf32> to vector<8x256xf32>
    %c4_99 = arith.constant 4 : index
    %c0_100 = arith.constant 0 : index
    %c0_101 = arith.constant 0 : index
    %188 = vector.load %arg7[%c4_99, %c0_100, %c0_101] : memref<9x3x8xbf16, #tpu.memory_space<vmem>>, vector<1x3x8xbf16>
    %189 = vector.shape_cast %188 : vector<1x3x8xbf16> to vector<3x8xbf16>
    %190 = arith.truncf %187 : vector<8x256xf32> to vector<8x256xbf16>
    %cst_102 = arith.constant dense<0.000000e+00> : vector<3x256xf32>
    %191 = tpu.matmul %189, %190, %cst_102 {dimension_numbers = #tpu.dot_dimension_numbers<[1], [0], [0], [1], [0, 0, 1, 1], [], []>} : vector<3x8xbf16>, vector<8x256xbf16>, vector<3x256xf32> -> vector<3x256xf32>
    %192 = arith.addf %186, %191 : vector<3x256xf32>
    %193 = vector.extract_strided_slice %155 {offsets = [0, 129], sizes = [8, 256], strides = [1, 1]} : vector<8x512xf32> to vector<8x256xf32>
    %194 = vector.broadcast %3 : vector<1x256xf32> to vector<8x256xf32>
    %195 = arith.mulf %193, %194 : vector<8x256xf32>
    %c5_103 = arith.constant 5 : index
    %c0_104 = arith.constant 0 : index
    %c0_105 = arith.constant 0 : index
    %196 = vector.load %arg7[%c5_103, %c0_104, %c0_105] : memref<9x3x8xbf16, #tpu.memory_space<vmem>>, vector<1x3x8xbf16>
    %197 = vector.shape_cast %196 : vector<1x3x8xbf16> to vector<3x8xbf16>
    %198 = arith.truncf %195 : vector<8x256xf32> to vector<8x256xbf16>
    %cst_106 = arith.constant dense<0.000000e+00> : vector<3x256xf32>
    %199 = tpu.matmul %197, %198, %cst_106 {dimension_numbers = #tpu.dot_dimension_numbers<[1], [0], [0], [1], [0, 0, 1, 1], [], []>} : vector<3x8xbf16>, vector<8x256xbf16>, vector<3x256xf32> -> vector<3x256xf32>
    %200 = arith.addf %192, %199 : vector<3x256xf32>
    %201 = vector.extract_strided_slice %155 {offsets = [0, 143], sizes = [8, 256], strides = [1, 1]} : vector<8x512xf32> to vector<8x256xf32>
    %202 = vector.broadcast %1 : vector<1x256xf32> to vector<8x256xf32>
    %203 = arith.mulf %201, %202 : vector<8x256xf32>
    %c6_107 = arith.constant 6 : index
    %c0_108 = arith.constant 0 : index
    %c0_109 = arith.constant 0 : index
    %204 = vector.load %arg7[%c6_107, %c0_108, %c0_109] : memref<9x3x8xbf16, #tpu.memory_space<vmem>>, vector<1x3x8xbf16>
    %205 = vector.shape_cast %204 : vector<1x3x8xbf16> to vector<3x8xbf16>
    %206 = arith.truncf %203 : vector<8x256xf32> to vector<8x256xbf16>
    %cst_110 = arith.constant dense<0.000000e+00> : vector<3x256xf32>
    %207 = tpu.matmul %205, %206, %cst_110 {dimension_numbers = #tpu.dot_dimension_numbers<[1], [0], [0], [1], [0, 0, 1, 1], [], []>} : vector<3x8xbf16>, vector<8x256xbf16>, vector<3x256xf32> -> vector<3x256xf32>
    %208 = arith.addf %200, %207 : vector<3x256xf32>
    %209 = vector.extract_strided_slice %155 {offsets = [0, 144], sizes = [8, 256], strides = [1, 1]} : vector<8x512xf32> to vector<8x256xf32>
    %c7_111 = arith.constant 7 : index
    %c0_112 = arith.constant 0 : index
    %c0_113 = arith.constant 0 : index
    %210 = vector.load %arg7[%c7_111, %c0_112, %c0_113] : memref<9x3x8xbf16, #tpu.memory_space<vmem>>, vector<1x3x8xbf16>
    %211 = vector.shape_cast %210 : vector<1x3x8xbf16> to vector<3x8xbf16>
    %212 = arith.truncf %209 : vector<8x256xf32> to vector<8x256xbf16>
    %cst_114 = arith.constant dense<0.000000e+00> : vector<3x256xf32>
    %213 = tpu.matmul %211, %212, %cst_114 {dimension_numbers = #tpu.dot_dimension_numbers<[1], [0], [0], [1], [0, 0, 1, 1], [], []>} : vector<3x8xbf16>, vector<8x256xbf16>, vector<3x256xf32> -> vector<3x256xf32>
    %214 = arith.addf %208, %213 : vector<3x256xf32>
    %215 = vector.extract_strided_slice %155 {offsets = [0, 145], sizes = [8, 256], strides = [1, 1]} : vector<8x512xf32> to vector<8x256xf32>
    %216 = vector.broadcast %3 : vector<1x256xf32> to vector<8x256xf32>
    %217 = arith.mulf %215, %216 : vector<8x256xf32>
    %c8_115 = arith.constant 8 : index
    %c0_116 = arith.constant 0 : index
    %c0_117 = arith.constant 0 : index
    %218 = vector.load %arg7[%c8_115, %c0_116, %c0_117] : memref<9x3x8xbf16, #tpu.memory_space<vmem>>, vector<1x3x8xbf16>
    %219 = vector.shape_cast %218 : vector<1x3x8xbf16> to vector<3x8xbf16>
    %220 = arith.truncf %217 : vector<8x256xf32> to vector<8x256xbf16>
    %cst_118 = arith.constant dense<0.000000e+00> : vector<3x256xf32>
    %221 = tpu.matmul %219, %220, %cst_118 {dimension_numbers = #tpu.dot_dimension_numbers<[1], [0], [0], [1], [0, 0, 1, 1], [], []>} : vector<3x8xbf16>, vector<8x256xbf16>, vector<3x256xf32> -> vector<3x256xf32>
    %222 = arith.addf %214, %221 : vector<3x256xf32>
    %c0_119 = arith.constant 0 : index
    %c0_120 = arith.constant 0 : index
    %223 = vector.load %arg8[%c0_119, %c0_120] : memref<3x1xf32, #tpu.memory_space<vmem>>, vector<3x1xf32>
    %224 = vector.broadcast %223 : vector<3x1xf32> to vector<3x256xf32>
    %225 = arith.addf %222, %224 : vector<3x256xf32>
    %226 = vector.extract_strided_slice %225 {offsets = [0, 0], sizes = [1, 256], strides = [1, 1]} : vector<3x256xf32> to vector<1x256xf32>
    %227 = vector.extract_strided_slice %225 {offsets = [1, 0], sizes = [1, 256], strides = [1, 1]} : vector<3x256xf32> to vector<1x256xf32>
    %228 = vector.extract_strided_slice %225 {offsets = [2, 0], sizes = [1, 256], strides = [1, 1]} : vector<3x256xf32> to vector<1x256xf32>
    %229 = arith.mulf %226, %226 : vector<1x256xf32>
    %230 = arith.mulf %227, %227 : vector<1x256xf32>
    %231 = arith.addf %229, %230 : vector<1x256xf32>
    %232 = arith.mulf %228, %228 : vector<1x256xf32>
    %233 = arith.addf %231, %232 : vector<1x256xf32>
    %cst_121 = arith.constant 9.99999996E-13 : f32
    %234 = vector.broadcast %cst_121 : f32 to vector<1x256xf32>
    %235 = arith.addf %233, %234 : vector<1x256xf32>
    %236 = math.rsqrt %235 : vector<1x256xf32>
    %237 = vector.broadcast %236 : vector<1x256xf32> to vector<3x256xf32>
    %238 = arith.mulf %225, %237 : vector<3x256xf32>
    %c0_122 = arith.constant 0 : index
    %c0_123 = arith.constant 0 : index
    %c0_124 = arith.constant 0 : index
    %239 = vector.load %arg9[%c0_122, %c0_123, %c0_124] : memref<1x3x256xf32, #tpu.memory_space<vmem>>, vector<1x3x256xf32>
    %240 = vector.shape_cast %239 : vector<1x3x256xf32> to vector<3x256xf32>
    %241 = vector.shape_cast %238 : vector<3x256xf32> to vector<1x3x256xf32>
    tpu.vector_store %arg9[%c0_122, %c0_123, %c0_124], %241 {strides = array<i32>} : memref<1x3x256xf32, #tpu.memory_space<vmem>>, vector<1x3x256xf32>,
    return
  }
  func.func @transform_0(%arg0: i32) -> (i32, i32, i32) {
    %c0_i32 = arith.constant 0 : i32
    %c0_i32_0 = arith.constant 0 : i32
    %c0_i32_1 = arith.constant 0 : i32
    return %arg0, %c0_i32, %c0_i32_0 : i32, i32, i32
  }
  func.func @transform_1(%arg0: i32) -> (i32, i32, i32) {
    %c0_i32 = arith.constant 0 : i32
    %c0_i32_0 = arith.constant 0 : i32
    %c0_i32_1 = arith.constant 0 : i32
    %c0_i32_2 = arith.constant 0 : i32
    return %c0_i32, %c0_i32_0, %c0_i32_1 : i32, i32, i32
  }
  func.func @transform_2(%arg0: i32) -> (i32, i32, i32) {
    %c0_i32 = arith.constant 0 : i32
    %c0_i32_0 = arith.constant 0 : i32
    %c0_i32_1 = arith.constant 0 : i32
    %c0_i32_2 = arith.constant 0 : i32
    return %c0_i32, %c0_i32_0, %c0_i32_1 : i32, i32, i32
  }
  func.func @transform_3(%arg0: i32) -> (i32, i32) {
    %c0_i32 = arith.constant 0 : i32
    %c0_i32_0 = arith.constant 0 : i32
    %c0_i32_1 = arith.constant 0 : i32
    return %c0_i32, %c0_i32_0 : i32, i32
  }
  func.func @transform_4(%arg0: i32) -> (i32, i32, i32) {
    %c0_i32 = arith.constant 0 : i32
    %c0_i32_0 = arith.constant 0 : i32
    %c0_i32_1 = arith.constant 0 : i32
    %c0_i32_2 = arith.constant 0 : i32
    return %c0_i32, %c0_i32_0, %c0_i32_1 : i32, i32, i32
  }
  func.func @transform_5(%arg0: i32) -> (i32, i32) {
    %c0_i32 = arith.constant 0 : i32
    %c0_i32_0 = arith.constant 0 : i32
    %c0_i32_1 = arith.constant 0 : i32
    return %c0_i32, %c0_i32_0 : i32, i32
  }
  func.func @transform_6(%arg0: i32) -> (i32, i32, i32) {
    %c0_i32 = arith.constant 0 : i32
    %c0_i32_0 = arith.constant 0 : i32
    %c0_i32_1 = arith.constant 0 : i32
    %c0_i32_2 = arith.constant 0 : i32
    return %c0_i32, %c0_i32_0, %c0_i32_1 : i32, i32, i32
  }
  func.func @transform_7(%arg0: i32) -> (i32, i32) {
    %c0_i32 = arith.constant 0 : i32
    %c0_i32_0 = arith.constant 0 : i32
    %c0_i32_1 = arith.constant 0 : i32
    return %c0_i32, %c0_i32_0 : i32, i32
  }
  func.func @transform_8(%arg0: i32) -> (i32, i32, i32) {
    %c0_i32 = arith.constant 0 : i32
    %c0_i32_0 = arith.constant 0 : i32
    %c0_i32_1 = arith.constant 0 : i32
    return %arg0, %c0_i32, %c0_i32_0 : i32, i32, i32
  }
}

</mosaic_0001>

<bundles_post_ra>
// kernel: cnn_forward.1
= control target key start
LH: loop header
LB: loop body
LE: loop exit
PB: predicated region body
PF: predicated region fallthrough
CT: control target
= control target key end

     0   :  { %s2559_s27 = smov 0   ;;  %s3084_s0 = inlined_call_operand.vmem [shape: f32[2,4,256], index: 0, kind: input, shape index: {}]   ;;  %s3085_s1 = inlined_call_operand.vmem [shape: f32[2,1,256], index: 1, kind: input, shape index: {}]   ;;  %s3086_s2 = inlined_call_operand.vmem [shape: bf16[9,16,4], index: 2, kind: input, shape index: {}]   ;;  %s3087_s3 = inlined_call_operand.vmem [shape: f32[16,1], index: 3, kind: input, shape index: {}]   ;;  %s3088_s4 = inlined_call_operand.vmem [shape: bf16[9,8,16], index: 4, kind: input, shape index: {}]   ;;  %s3089_s5 = inlined_call_operand.vmem [shape: f32[8,1], index: 5, kind: input, shape index: {}]   ;;  %s3090_s6 = inlined_call_operand.vmem [shape: bf16[9,3,8], index: 6, kind: input, shape index: {}]   ;;  %s3091_s7 = inlined_call_operand.vmem [shape: f32[3,1], index: 7, kind: input, shape index: {}]   ;;  %s3092_s8 = inlined_call_operand.vmem [shape: f32[2,3,256], index: 8, kind: output, shape index: {}]  }
   0x1 LB: > { %s2330_s28 = sadd.s32 4294967295, %s2502_s27   ;;  %p2334_p0 = scmp.ge.s32.totalorder %s2502_s27, 1  ;;  %s2502_s27 = sphi %s2559_s27, %s18_s27  }
   0x2   : > { %p262_p1 = scmp.lt.s32.totalorder %s2502_s27, 3 }
   0x4   : > { %p263_p2 = pnand %p2334_p0, %p262_p1 }
   0x5   : > { %v315_v0 = vlaneseq (!%p263_p2)  ;;  %v307_v1 = vld [vmem:[%s3085_s1] sm:$0x3] (!%p263_p2)  ;;  %p296_p3 = scmp.lt.s32.totalorder (!%p263_p2), %s2330_s28, 1  ;;  %v2339_v3 = vld [vmem:[%s3085_s1 + $0x2] sm:$0x3] (!%p263_p2)  ;;  %s2504_s11 = smov (!%p263_p2), 111  }
   0x6   : > { %266 = sbr.rel (%p263_p2) target bundleno = 1412 (0x584), region = 52  ;;  %s2505_s12 = smov (!%p263_p2), 113   ;;  %v2508_v13 = vmov (!%p263_p2), 0.0|0.0   ;;  %v2511_v15 = vmov (!%p263_p2), 0   ;;  %vm327_vm0 = vcmask (!%p263_p2), 908288   ;;  %vm499_vm1 = vcmask (!%p263_p2), 924672  }
   0x7   : > { %v316_v2 = vshrl.u32 (!%p263_p2), %v315_v0, 7  ;;  %s2506_s17 = smov (!%p263_p2), 127   ;;  %s2507_s18 = smov (!%p263_p2), 1   ;;  %406 = vmatprep.mubr.bf16.mxu0 (!%p263_p2), %v2511_v15  ;;  %2480 = vset.pattern.permute.xlu0 (!%p263_p2), %v2511_v15  ;;  %vm590_vm2 = vcmask (!%p263_p2), 1039360   ;;  %vm360_vm3 = vcmask (!%p263_p2), 130048   ;;  %vm618_vm4 = vcmask (!%p263_p2), 7168  }
   0x8   : > { %s2509_s19 = smov (!%p263_p2), 16   ;;  %s2510_s20 = smov (!%p263_p2), 15   ;;  %2481 = vset.pattern.permute.xlu1 (!%p263_p2), %v2511_v15  ;;  %1164 = vmatprep.mubr.bf16.mxu1 (!%p263_p2), %v2511_v15  ;;  %vm367_vm5 = vcmask (!%p263_p2), 1041408   ;;  %v2483_v55 = vld [vmem:[%s3086_s2 + $0x8] sm:$0xff] (!%p263_p2)   ;;  %vm363_vm6 = vcmask (!%p263_p2), 31744   ;;  %vm527_vm7 = vcmask (!%p263_p2), 121856  }
   0x9   : > { %v2573_v4 = vsub.s32 (!%p263_p2), 0, %v316_v2  ;;  %v321_v5 = vsub.s32 (!%p263_p2), 1, %v316_v2  ;;  %s2512_s21 = smov (!%p263_p2), 17   ;;  %s2513_s24 = smov (!%p263_p2), 112   ;;  %vm431_vm8 = vcmask (!%p263_p2), 138240   ;;  %vm937_vm9 = vcmask (!%p263_p2), 916480  }
   0xa   : > { %vm1682_vm10 = vcmask (!%p263_p2), 1043456   ;;  %vm1678_vm11 = vcmask (!%p263_p2), 64512  }
   0xb   : > { %v318_v6 = vrot.slane (!%p263_p2), %v307_v1, %v2573_v4  ;;  %v2577_v7 = vrot.slane (!%p263_p2), %v2339_v3, %v2573_v4  ;;  %v322_v8 = vrot.slane (!%p263_p2), %v307_v1, %v321_v5  ;;  %v2584_v9 = vrot.slane (!%p263_p2), %v2339_v3, %v321_v5 }
   0xd   : > { %s3094_s28 = smov (!%p296_p3, %s2330_s28), 1  ;;  %323 = vrot.lane.b32.xlu0 %v318_v6, %s2504_s11  ;;  %495 = vrot.lane.b32.xlu1 %v2577_v7, %s2505_s12 }
   0xe   : > { %s2428_s13 = sshll.u32 %s3094_s28, 3 }
   0xf   : > { %s300_s16 = scalar_lea.vmem %s3084_s0, %s2428_s13 }
  0x10   : > { %v2597_v10 = vld [vmem:[%s300_s16] sm:$0xff] }
  0x11   : > { %325 = vrot.lane.b32.xlu0 %v322_v8, %s2504_s11  ;;  %497 = vrot.lane.b32.xlu1 %v2584_v9, %s2505_s12  ;;  %v2605_v11 = vpack.c.bf16 %v2597_v10, %v2597_v10  ;;  %v2609_v12 = vcombine.high %v2597_v10, %v2597_v10 }
  0x13   : > { %v2617_v14 = vpack.c.bf16 %v2609_v12, %v2609_v12 }
  0x15   : > { %586 = vrot.lane.b32.xlu0 %v318_v6, %s2506_s17  ;;  %588 = vrot.lane.b32.xlu1 %v322_v8, %s2506_s17 }
  0x19   : > { %741 = vrot.lane.b32.xlu0 %v2577_v7, %s2507_s18  ;;  %743 = vrot.lane.b32.xlu1 %v2584_v9, %s2507_s18 }
  0x1d   : > { %354 = vrot.lane.b32.xlu0 %v2508_v13, %s2509_s19  ;;  %356 = vrot.lane.b32.xlu1 %v2605_v11, %s2509_s19 }
  0x21   : > { %358 = vrot.lane.b32.xlu0 %v2617_v14, %s2509_s19  ;;  %832 = vrot.lane.b32.xlu1 %v318_v6, %s2510_s20 }
  0x25   : > { %834 = vrot.lane.b32.xlu0 %v322_v8, %s2510_s20 }
  0x7f   : > { %v324_v16 = vpop.permute.xlu0 %323  ;;  %v496_v17 = vpop.permute.xlu1 %495 }
  0x80   : > { %v332_v18 = vmul.f32 0.0, %v324_v16  ;;  %v504_v28 = vmul.f32 0.0, %v496_v17 }
  0x82   : > { %v337_v19 = vpack.c.bf16 %v332_v18, %v332_v18  ;;  %v510_v33 = vpack.c.bf16 %v504_v28, %v504_v28 }
  0x83   : > { %v2627_v20 = vpop.permute.xlu0 %325  ;;  %v2629_v21 = vpop.permute.xlu1 %497 }
  0x84   : > { %425 = vrot.lane.b32.xlu1 %v337_v19, %s2512_s21  ;;  %v334_v22 = vmul.f32 %v2627_v20, %v2609_v12  ;;  %v2636_v23 = vsel %vm327_vm0, %v324_v16, %v2627_v20  ;;  %v2640_v24 = vsel %vm499_vm1, %v496_v17, %v2629_v21  ;;  %v506_v34 = vmul.f32 %v2629_v21, %v2609_v12  ;;  %v2484_v17 = vld [vmem:[%s3086_s2] sm:$0xff]  }
  0x85   : > { %v333_v25 = vmul.f32 %v2636_v23, %v2597_v10  ;;  %v505_v27 = vmul.f32 %v2640_v24, %v2597_v10 }
  0x86   : > { %v339_v26 = vpack.c.bf16 %v334_v22, %v334_v22  ;;  %v512_v39 = vpack.c.bf16 %v506_v34, %v506_v34 }
  0x87   : > { %v338_v29 = vpack.c.bf16 %v333_v25, %v333_v25  ;;  %v587_v30 = vpop.permute.xlu0 %586  ;;  %v2646_v31 = vpop.permute.xlu1 %588  ;;  %v511_v32 = vpack.c.bf16 %v505_v27, %v505_v27 }
  0x88   : > { %429 = vrot.lane.b32.xlu1 %v339_v26, %s2512_s21  ;;  %v595_v37 = vmul.f32 0.0, %v587_v30  ;;  %v2658_v38 = vsel %vm590_vm2, %v587_v30, %v2646_v31  ;;  %v597_v43 = vmul.f32 %v2646_v31, %v2609_v12 }
  0x89   : > { %427 = vrot.lane.b32.xlu0 %v338_v29, %s2512_s21  ;;  %v596_v45 = vmul.f32 %v2658_v38, %v2597_v10 }
  0x8a   : > { %v601_v42 = vpack.c.bf16 %v595_v37, %v595_v37  ;;  %v603_v49 = vpack.c.bf16 %v597_v43, %v597_v43 }
  0x8b   : > { %v2652_v35 = vpop.permute.xlu0 %741  ;;  %v744_v36 = vpop.permute.xlu1 %743  ;;  %v602_v52 = vpack.c.bf16 %v596_v45, %v596_v45  ;;  %v1088_v45 = vld [vmem:[%s3087_s3 + $0x8] sm:$0xff] }
  0x8c   : > { %523 = vrot.lane.b32.xlu1 %v511_v32, %s2510_s20  ;;  %v2673_v46 = vsel %vm618_vm4, %v2652_v35, %v744_v36  ;;  %v750_v53 = vmul.f32 %v2652_v35, %v2597_v10  ;;  %v752_v59 = vmul.f32 0.0, %v744_v36  ;;  %v2485_v36 = vld [vmem:[%s3086_s2 + $0x10] sm:$0xff]  }
  0x8d   : > { %521 = vrot.lane.b32.xlu0 %v510_v33, %s2510_s20  ;;  %v751_v50 = vmul.f32 %v2673_v46, %v2609_v12 }
  0x8e   : > { %v756_v60 = vpack.c.bf16 %v750_v53, %v750_v53  ;;  %v758_v0 = vpack.c.bf16 %v752_v59, %v752_v59 }
  0x8f   : > { %v2660_v40 = vpop.permute.xlu0 %354  ;;  %v357_v41 = vpop.permute.xlu1 %356  ;;  %v757_v57 = vpack.c.bf16 %v751_v50, %v751_v50 }
  0x90   : > { %996 = vrot.lane.b32.xlu1 %v2577_v7, %s2512_s21  ;;  %v361_v44 = vsel %vm360_vm3, %v2660_v40, %v357_v41 }
  0x91   : > { %525 = vrot.lane.b32.xlu0 %v512_v39, %s2510_s20  ;;  %v369_v48 = vsel %vm367_vm5, %v361_v44, 0 }
  0x93   : > { %v359_v47 = vpop.permute.xlu0 %358  ;;  %v2684_v54 = vpop.permute.xlu1 %832 }
  0x94   : > { %612 = vrot.lane.b32.xlu1 %v601_v42, %s2507_s18  ;;  %v362_v51 = vsel %vm360_vm3, %v357_v41, %v359_v47  ;;  %v841_v58 = vmul.f32 %v2684_v54, %v2597_v10  ;;  %v1087_v47 = vld [vmem:[%s3087_s3] sm:$0xff] }
  0x95   : > { %998 = vrot.lane.b32.xlu0 %v2584_v9, %s2512_s21  ;;  %2343 = vmatprep.subr.msk.bf16.mxu0 %vm367_vm5, %v362_v51 }
  0x96   : > { %375 = vmatpush1.bf16.msra.mxu0 %v369_v48  ;;  %v847_v63 = vpack.c.bf16 %v841_v58, %v841_v58 }
  0x97   : > { %v835_v56 = vpop.permute.xlu0 %834 }
  0x98   : > { %616 = vrot.lane.b32.xlu1 %v603_v49, %s2507_s18  ;;  %v2697_v61 = vsel %vm527_vm7, %v2684_v54, %v835_v56  ;;  %v843_v62 = vmul.f32 0.0, %v835_v56  ;;  %v2486_v49 = vld [vmem:[%s3086_s2 + $0x18] sm:$0xff]   ;;  %v2487_v56 = vld [vmem:[%s3086_s2 + $0x20] sm:$0xff]  }
  0x99   : > { %614 = vrot.lane.b32.xlu0 %v602_v52, %s2507_s18  ;;  %2344 = vmatmul.mubr.msk.bf16.vlgmr.msra.gmra.mrb[0].mxu0 %vm363_vm6, %v2483_v55  ;;  %v842_v1 = vmul.f32 %v2697_v61, %v2609_v12  ;;  %v689_v52 = vsel %vm367_vm5, %v2605_v11, 0 }
  0x9a   : > { %475 = vmatprep.mubr.bf16.mxu0 %v2511_v15  ;;  %v849_v2 = vpack.c.bf16 %v843_v62, %v843_v62 }
  0x9b   : > { %v848_v3 = vpack.c.bf16 %v842_v1, %v842_v1 }
  0x9c   : > { %769 = vrot.lane.b32.xlu1 %v757_v57, %s2506_s17 }
  0x9d   : > { %767 = vrot.lane.b32.xlu0 %v756_v60, %s2506_s17 }
  0xa0   : > { %858 = vrot.lane.b32.xlu1 %v847_v63, %s2505_s12  ;;  %v2488_v63 = vld [vmem:[%s3086_s2 + $0x28] sm:$0xff]  }
  0xa1   : > { %771 = vrot.lane.b32.xlu0 %v758_v0, %s2506_s17 }
  0xa4   : > { %862 = vrot.lane.b32.xlu1 %v849_v2, %s2505_s12 }
  0xa5   : > { %860 = vrot.lane.b32.xlu0 %v848_v3, %s2505_s12 }
  0xa8   : > { %933 = vrot.lane.b32.xlu1 %v2617_v14, %s2513_s24 }
  0xa9   : > { %931 = vrot.lane.b32.xlu0 %v2605_v11, %s2513_s24 }
  0xad   : > { %935 = vrot.lane.b32.xlu0 %v2508_v13, %s2513_s24 }
  0xf6   : > { %v2714_v5 = vpop.permute.xlu1 %425 }
  0xfa   : > { %v430_v6 = vpop.permute.xlu1 %429 }
  0xfb   : > { %v428_v7 = vpop.permute.xlu0 %427 }
  0xfc   : > { %v432_v8 = vsel %vm431_vm8, %v2714_v5, %v428_v7  ;;  %v433_v9 = vsel %vm431_vm8, %v428_v7, %v430_v6  ;;  %v2489_v7 = vld [vmem:[%s3086_s2 + $0x30] sm:$0xff]  }
  0xfd   : > { %v438_v16 = vsel %vm367_vm5, %v432_v8, 0  ;;  %2346 = vmatprep.subr.msk.bf16.mxu0 %vm367_vm5, %v433_v9  ;;  %v2490_v9 = vld [vmem:[%s3086_s2 + $0x38] sm:$0xff]  }
  0xfe   : > { %444 = vmatpush1.bf16.msra.mxu0 %v438_v16  ;;  %v524_v13 = vpop.permute.xlu1 %523 }
  0xff   : > { %v2724_v18 = vpop.permute.xlu0 %521 }
 0x100   : > { %v528_v19 = vsel %vm527_vm7, %v2724_v18, %v524_v13 }
 0x101   : > { %2347 = vmatmul.mubr.msk.bf16.vlgmr.msra.gmra.mrb[0].mxu0 %vm363_vm6, %v2484_v17  ;;  %v534_v28 = vsel %vm367_vm5, %v528_v19, 0 }
 0x102   : > { %v2729_v22 = vpop.permute.xlu1 %996  ;;  %571 = vmatprep.mubr.bf16.mxu0 %v2511_v15 }
 0x103   : > { %v526_v25 = vpop.permute.xlu0 %525  ;;  %v1005_v26 = vmul.f32 %v2729_v22, %v2597_v10 }
 0x104   : > { %v529_v27 = vsel %vm527_vm7, %v524_v13, %v526_v25 }
 0x105   : > { %2351 = vmatprep.subr.msk.bf16.mxu0 %vm367_vm5, %v529_v27  ;;  %v1011_v29 = vpack.c.bf16 %v1005_v26, %v1005_v26  ;;  %v2491_v27 = vld [vmem:[%s3086_s2 + $0x40] sm:$0xff]  }
 0x106   : > { %540 = vmatpush1.bf16.msra.mxu0 %v534_v28  ;;  %v2737_v30 = vpop.permute.xlu1 %612 }
 0x107   : > { %v999_v32 = vpop.permute.xlu0 %998  ;;  %1022 = vrot.lane.b32.xlu1 %v1011_v29, %s2504_s11 }
 0x108   : > { %v2742_v33 = vsel %vm431_vm8, %v2729_v22, %v999_v32  ;;  %v1007_v34 = vmul.f32 0.0, %v999_v32 }
 0x109   : > { %v1006_v10 = vmul.f32 %v2742_v33, %v2609_v12 }
 0x10a   : > { %v1013_v37 = vpack.c.bf16 %v1007_v34, %v1007_v34  ;;  %v617_v39 = vpop.permute.xlu1 %616 }
 0x10b   : > { %v1012_v41 = vpack.c.bf16 %v1006_v10, %v1006_v10  ;;  %v615_v42 = vpop.permute.xlu0 %614 }
 0x10c   : > { %1026 = vrot.lane.b32.xlu1 %v1013_v37, %s2504_s11  ;;  %v619_v43 = vsel %vm618_vm4, %v2737_v30, %v615_v42  ;;  %v620_v44 = vsel %vm618_vm4, %v615_v42, %v617_v39 }
 0x10d   : > { %1024 = vrot.lane.b32.xlu0 %v1012_v41, %s2504_s11  ;;  %2352 = vmatmul.mubr.msk.bf16.vlgmr.msra.gmra.mrb[0].mxu0 %vm363_vm6, %v2485_v36  ;;  %v625_v12 = vsel %vm367_vm5, %v619_v43, 0 }
 0x10e   : > { %2356 = vmatprep.subr.msk.bf16.mxu0 %vm367_vm5, %v620_v44  ;;  %662 = vmatprep.mubr.bf16.mxu0 %v2511_v15  ;;  %v770_v51 = vpop.permute.xlu1 %769 }
 0x10f   : > { %631 = vmatpush1.bf16.msra.mxu0 %v625_v12  ;;  %v768_v48 = vpop.permute.xlu0 %767 }
 0x110   : > { %2361 = vmatprep.subr.msk.bf16.mxu0 %vm367_vm5, %v2617_v14  ;;  %1096 = vperm.xlu1 %2481, %v1088_v45   ;;  %v774_v55 = vsel %vm590_vm2, %v768_v48, %v770_v51 }
 0x111   : > { %1091 = vperm.xlu0 %2480, %v1087_v47   ;;  %v780_v11 = vsel %vm367_vm5, %v774_v55, 0 }
 0x112   : > { %v859_v14 = vpop.permute.xlu1 %858 }
 0x113   : > { %v2769_v50 = vpop.permute.xlu0 %771 }
 0x114   : > { %v775_v53 = vsel %vm590_vm2, %v770_v51, %v2769_v50 }
 0x116   : > { %v2782_v58 = vpop.permute.xlu1 %862 }
 0x117   : > { %v861_v57 = vpop.permute.xlu0 %860 }
 0x118   : > { %v866_v59 = vsel %vm499_vm1, %v861_v57, %v2782_v58  ;;  %v865_v62 = vsel %vm499_vm1, %v859_v14, %v861_v57 }
 0x119   : > { %2357 = vmatmul.mubr.msk.bf16.vlgmr.msra.gmra.mrb[0].mxu0 %vm363_vm6, %v2486_v49  ;;  %v871_v2 = vsel %vm367_vm5, %v865_v62, 0 }
 0x11a   : > { %695 = vmatpush1.bf16.msra.mxu0 %v689_v52  ;;  %726 = vmatprep.mubr.bf16.mxu0 %v2511_v15  ;;  %v934_v1 = vpop.permute.xlu1 %933 }
 0x11b   : > { %2366 = vmatprep.subr.msk.bf16.mxu0 %vm367_vm5, %v775_v53  ;;  %v932_v60 = vpop.permute.xlu0 %931 }
 0x11c   : > { %v938_v6 = vsel %vm937_vm9, %v932_v60, %v934_v1 }
 0x11d   : > { %v944_v8 = vsel %vm367_vm5, %v938_v6, 0 }
 0x11f   : > { %v2794_v0 = vpop.permute.xlu0 %935 }
 0x120   : > { %v939_v3 = vsel %vm937_vm9, %v934_v1, %v2794_v0 }
 0x125   : > { %2362 = vmatmul.mubr.msk.bf16.vlgmr.msra.gmra.mrb[0].mxu0 %vm363_vm6, %v2487_v56 }
 0x126   : > { %786 = vmatpush1.bf16.msra.mxu0 %v780_v11  ;;  %817 = vmatprep.mubr.bf16.mxu0 %v2511_v15 }
 0x127   : > { %2371 = vmatprep.subr.msk.bf16.mxu0 %vm367_vm5, %v866_v59 }
 0x131   : > { %2367 = vmatmul.mubr.msk.bf16.vlgmr.msra.gmra.mrb[0].mxu0 %vm363_vm6, %v2488_v63 }
 0x132   : > { %877 = vmatpush1.bf16.msra.mxu0 %v871_v2  ;;  %908 = vmatprep.mubr.bf16.mxu0 %v2511_v15 }
 0x133   : > { %2376 = vmatprep.subr.msk.bf16.mxu0 %vm367_vm5, %v939_v3 }
 0x13d   : > { %2372 = vmatmul.mubr.msk.bf16.vlgmr.msra.gmra.mrb[0].mxu0 %vm363_vm6, %v2489_v7 }
 0x13e   : > { %950 = vmatpush1.bf16.msra.mxu0 %v944_v8  ;;  %981 = vmatprep.mubr.bf16.mxu0 %v2511_v15 }
 0x149   : > { %2377 = vmatmul.mubr.msk.bf16.vlgmr.msra.gmra.mrb[0].mxu0 %vm363_vm6, %v2490_v9 }
 0x14a   : > { %1072 = vmatprep.mubr.bf16.mxu0 %v2511_v15 }
 0x179   : > { %v1023_v16 = vpop.permute.xlu1 %1022 }
 0x17e   : > { %v2814_v17 = vpop.permute.xlu1 %1026 }
 0x17f   : > { %v1025_v13 = vpop.permute.xlu0 %1024 }
 0x180   : > { %v1029_v19 = vsel %vm327_vm0, %v1023_v16, %v1025_v13  ;;  %v1030_v25 = vsel %vm327_vm0, %v1025_v13, %v2814_v17 }
 0x181   : > { %v1035_v26 = vsel %vm367_vm5, %v1029_v19, 0  ;;  %2381 = vmatprep.subr.msk.bf16.mxu0 %vm367_vm5, %v1030_v25 }
 0x182   : > { %1041 = vmatpush1.bf16.msra.mxu0 %v1035_v26 }
 0x185   : > { %2382 = vmatmul.mubr.msk.bf16.vlgmr.msra.gmra.mrb[0].mxu0 %vm363_vm6, %v2491_v27 }
 0x186   : > { %1721 = vmatprep.mubr.bf16.mxu0 %v2511_v15 }
 0x18f   : > { %v1097_v32 = vpop.permute.xlu1 %1096 }
 0x190   : > { %v1092_v28 = vpop.permute.xlu0 %1091 }
 0x258   : > { %v1074_v29 = vpop.f32.mrb[0].mxu0 }
 0x259   : > { %v1099_v34 = vadd.f32 %v1092_v28, %v1074_v29  ;;  %v1076_v10 = vpop.f32.mrb[1].mxu0 }
 0x25a   : > { %v1100_v36 = vadd.f32 %v1092_v28, %v1076_v10  ;;  %v1078_v37 = vpop.f32.mrb[2].mxu0 }
 0x25b   : > { %v1103_v39 = vmax.f32 %v1099_v34, 0.0  ;;  %v1101_v41 = vadd.f32 %v1097_v32, %v1078_v37  ;;  %v1080_v42 = vpop.f32.mrb[3].mxu0 }
 0x25c   : > { %v1104_v43 = vmax.f32 %v1100_v36, 0.0  ;;  %v1102_v44 = vadd.f32 %v1097_v32, %v1080_v42 }
 0x25d   : > { %v1105_v12 = vmax.f32 %v1101_v41, 0.0  ;;  %v1107_v45 = vmul.f32 %v1103_v39, %v2636_v23  ;;  %v1227_v47 = vmul.f32 %v1103_v39, %v2640_v24  ;;  %v1291_v48 = vmul.f32 %v1103_v39, %v2658_v38 }
 0x25e   : > { %v1106_v49 = vmax.f32 %v1102_v44, 0.0  ;;  %v1108_v51 = vmul.f32 %v1104_v43, %v2627_v20  ;;  %v1228_v52 = vmul.f32 %v1104_v43, %v2629_v21  ;;  %v1292_v53 = vmul.f32 %v1104_v43, %v2646_v31 }
 0x25f   : > { %v2832_v14 = vpack.c.bf16 %v1105_v12, %v1103_v39  ;;  %v1109_v55 = vmul.f32 %v1105_v12, %v2636_v23  ;;  %v1229_v56 = vmul.f32 %v1105_v12, %v2640_v24  ;;  %v1293_v57 = vmul.f32 %v1105_v12, %v2658_v38 }
 0x260   : > { %v2837_v11 = vpack.c.bf16 %v1106_v49, %v1104_v43  ;;  %v1110_v59 = vmul.f32 %v1106_v49, %v2627_v20  ;;  %v1230_v60 = vmul.f32 %v1106_v49, %v2629_v21  ;;  %v1294_v62 = vmul.f32 %v1106_v49, %v2646_v31 }
 0x261   : > { %1120 = vrot.lane.b32.xlu1 %v2832_v14, %s2509_s19  ;;  %v1112_v63 = vpack.c.bf16 %v1109_v55, %v1107_v45  ;;  %v1233_v1 = vpack.c.bf16 %v1229_v56, %v1227_v47  ;;  %v1297_v2 = vpack.c.bf16 %v1293_v57, %v1291_v48  ;;  %v1404_v3 = vmul.f32 %v1104_v43, %v2673_v46 }
 0x262   : > { %1122 = vrot.lane.b32.xlu0 %v2837_v11, %s2509_s19  ;;  %v1113_v6 = vpack.c.bf16 %v1110_v59, %v1108_v51  ;;  %v1234_v7 = vpack.c.bf16 %v1230_v60, %v1228_v52  ;;  %v1298_v8 = vpack.c.bf16 %v1294_v62, %v1292_v53  ;;  %v1406_v9 = vmul.f32 %v1106_v49, %v2673_v46  ;;  %v1111_v60 = vld [vmem:[%s3088_s4] sm:$0xf] }
 0x263   : > { %v1403_v16 = vmul.f32 %v1103_v39, %v2652_v35  ;;  %v1405_v13 = vmul.f32 %v1105_v12, %v2652_v35  ;;  %v1468_v19 = vmul.f32 %v1104_v43, %v2697_v61  ;;  %v1470_v25 = vmul.f32 %v1106_v49, %v2697_v61 }
 0x264   : > { %v1410_v26 = vpack.c.bf16 %v1406_v9, %v1404_v3  ;;  %v1467_v27 = vmul.f32 %v1103_v39, %v2684_v54  ;;  %v1469_v28 = vmul.f32 %v1105_v12, %v2684_v54  ;;  %v1588_v34 = vmul.f32 %v1104_v43, %v2742_v33 }
 0x265   : > { %1175 = vrot.lane.b32.xlu1 %v1112_v63, %s2512_s21  ;;  %v1409_v29 = vpack.c.bf16 %v1405_v13, %v1403_v16  ;;  %v1474_v32 = vpack.c.bf16 %v1470_v25, %v1468_v19  ;;  %v1590_v10 = vmul.f32 %v1106_v49, %v2742_v33  ;;  %v1587_v37 = vmul.f32 %v1103_v39, %v2729_v22  ;;  %v1651_v39 = vld [vmem:[%s3089_s5] sm:$0xff]  ;;  %v2392_v25 = vld [vmem:[%s3088_s4 + $0x14] sm:$0xf] }
 0x266   : > { %1177 = vrot.lane.b32.xlu0 %v1113_v6, %s2512_s21  ;;  %v1473_v36 = vpack.c.bf16 %v1469_v28, %v1467_v27  ;;  %v1589_v41 = vmul.f32 %v1105_v12, %v2729_v22  ;;  %v2383_v49 = vld [vmem:[%s3088_s4 + $0x4] sm:$0xf]  ;;  %v2388_v6 = vld [vmem:[%s3088_s4 + $0xc] sm:$0xf] }
 0x267   : > { %v1594_v42 = vpack.c.bf16 %v1590_v10, %v1588_v34 }
 0x268   : > { %v1593_v44 = vpack.c.bf16 %v1589_v41, %v1587_v37  ;;  %v2396_v41 = vld [vmem:[%s3088_s4 + $0x1c] sm:$0xf] }
 0x269   : > { %1237 = vrot.lane.b32.xlu1 %v1233_v1, %s2510_s20 }
 0x26a   : > { %1239 = vrot.lane.b32.xlu0 %v1234_v7, %s2510_s20 }
 0x26d   : > { %1301 = vrot.lane.b32.xlu1 %v1297_v2, %s2507_s18  ;;  %v2386_v2 = vld [vmem:[%s3088_s4 + $0x8] sm:$0xf] }
 0x26e   : > { %1303 = vrot.lane.b32.xlu0 %v1298_v8, %s2507_s18 }
 0x271   : > { %1415 = vrot.lane.b32.xlu1 %v1410_v26, %s2506_s17 }
 0x272   : > { %1413 = vrot.lane.b32.xlu0 %v1409_v29, %s2506_s17 }
 0x275   : > { %1479 = vrot.lane.b32.xlu1 %v1474_v32, %s2505_s12  ;;  %v2394_v32 = vld [vmem:[%s3088_s4 + $0x18] sm:$0xf] }
 0x276   : > { %1477 = vrot.lane.b32.xlu0 %v1473_v36, %s2505_s12 }
 0x279   : > { %1535 = vrot.lane.b32.xlu1 %v2837_v11, %s2513_s24 }
 0x27a   : > { %1533 = vrot.lane.b32.xlu0 %v2832_v14, %s2513_s24 }
 0x27d   : > { %1599 = vrot.lane.b32.xlu1 %v1594_v42, %s2504_s11 }
 0x27e   : > { %1597 = vrot.lane.b32.xlu0 %v1593_v44, %s2504_s11  ;;  %v2398_v44 = vld [vmem:[%s3088_s4 + $0x20] sm:$0xf] }
 0x281   : > { %1654 = vperm.xlu1 %2481, %v1651_v39  }
 0x2d3   : > { %v1121_v43 = vpop.permute.xlu1 %1120 }
 0x2d4   : > { %v1123_v12 = vpop.permute.xlu0 %1122  ;;  %v1124_v47 = vsel %vm360_vm3, %v2660_v40, %v1121_v43 }
 0x2d5   : > { %v1125_v45 = vsel %vm360_vm3, %v1121_v43, %v1123_v12 }
 0x2d6   : > { %1132 = vmatprep.subr.bf16.mxu1 %v1125_v45 }
 0x2d7   : > { %1133 = vmatpush1.bf16.msra.mxu1 %v1124_v47  ;;  %v1176_v48 = vpop.permute.xlu1 %1175 }
 0x2d8   : > { %v1178_v51 = vpop.permute.xlu0 %1177  ;;  %v1179_v53 = vsel %vm431_vm8, %v2714_v5, %v1176_v48 }
 0x2d9   : > { %v1180_v52 = vsel %vm431_vm8, %v1176_v48, %v1178_v51 }
 0x2da   : > { %2384 = vmatmul.mubr.msk.bf16.vlgmr.msra.gmra.mrb[0].mxu1 %vm360_vm3, %v2383_v49  ;;  %1186 = vmatprep.subr.bf16.mxu1 %v1180_v52 }
 0x2db   : > { %1187 = vmatpush1.bf16.msra.mxu1 %v1179_v53  ;;  %v1238_v55 = vpop.permute.xlu1 %1237  ;;  %1218 = vmatprep.mubr.bf16.mxu1 %v2511_v15 }
 0x2dc   : > { %v1240_v56 = vpop.permute.xlu0 %1239  ;;  %v1241_v1 = vsel %vm527_vm7, %v2724_v18, %v1238_v55 }
 0x2dd   : > { %v1242_v57 = vsel %vm527_vm7, %v1238_v55, %v1240_v56 }
 0x2de   : > { %1248 = vmatprep.subr.bf16.mxu1 %v1242_v57 }
 0x2df   : > { %v1302_v59 = vpop.permute.xlu1 %1301 }
 0x2e0   : > { %v1304_v62 = vpop.permute.xlu0 %1303  ;;  %v1305_v3 = vsel %vm618_vm4, %v2737_v30, %v1302_v59 }
 0x2e1   : > { %v1306_v63 = vsel %vm618_vm4, %v1302_v59, %v1304_v62 }
 0x2e2   : > { %2385 = vmatmul.mubr.msk.bf16.vlgmr.msra.gmra.mrb[4].mxu1 %vm360_vm3, %v1111_v60 }
 0x2e3   : > { %1249 = vmatpush1.bf16.msra.mxu1 %v1241_v1  ;;  %1280 = vmatprep.mubr.bf16.mxu1 %v2511_v15  ;;  %v1416_v7 = vpop.permute.xlu1 %1415 }
 0x2e4   : > { %1312 = vmatprep.subr.bf16.mxu1 %v1306_v63  ;;  %v1418_v8 = vsel %vm590_vm2, %v1416_v7, %v2769_v50  ;;  %v1414_v9 = vpop.permute.xlu0 %1413 }
 0x2e5   : > { %v1417_v13 = vsel %vm590_vm2, %v1414_v9, %v1416_v7 }
 0x2e7   : > { %v1480_v16 = vpop.permute.xlu1 %1479 }
 0x2e8   : > { %v1478_v19 = vpop.permute.xlu0 %1477 }
 0x2e9   : > { %v1481_v27 = vsel %vm499_vm1, %v1478_v19, %v1480_v16 }
 0x2ea   : > { %2387 = vmatmul.mubr.msk.bf16.vlgmr.msra.gmra.mrb[8].mxu1 %vm360_vm3, %v2386_v2 }
 0x2eb   : > { %1313 = vmatpush1.bf16.msra.mxu1 %v1305_v3  ;;  %1344 = vmatprep.mubr.bf16.mxu1 %v2511_v15  ;;  %v1536_v26 = vpop.permute.xlu1 %1535 }
 0x2ec   : > { %1360 = vmatprep.subr.bf16.mxu1 %v2837_v11  ;;  %v2390_v11 = vld [vmem:[%s3088_s4 + $0x10] sm:$0xf]  ;;  %v1538_v28 = vsel %vm937_vm9, %v1536_v26, %v2794_v0  ;;  %v1534_v29 = vpop.permute.xlu0 %1533 }
 0x2ed   : > { %v1537_v10 = vsel %vm937_vm9, %v1534_v29, %v1536_v26 }
 0x2ef   : > { %v1600_v34 = vpop.permute.xlu1 %1599 }
 0x2f0   : > { %v1602_v36 = vsel %vm327_vm0, %v1600_v34, %v2814_v17  ;;  %v1598_v37 = vpop.permute.xlu0 %1597 }
 0x2f1   : > { %v1601_v42 = vsel %vm327_vm0, %v1598_v37, %v1600_v34 }
 0x2f2   : > { %2389 = vmatmul.mubr.msk.bf16.vlgmr.msra.gmra.mrb[12].mxu1 %vm360_vm3, %v2388_v6 }
 0x2f3   : > { %1361 = vmatpush1.bf16.msra.mxu1 %v2832_v14  ;;  %1392 = vmatprep.mubr.bf16.mxu1 %v2511_v15  ;;  %v1482_v14 = vsel %vm499_vm1, %v1480_v16, %v2782_v58 }
 0x2f4   : > { %1424 = vmatprep.subr.bf16.mxu1 %v1418_v8 }
 0x2fa   : > { %2391 = vmatmul.mubr.msk.bf16.vlgmr.msra.gmra.mrb[16].mxu1 %vm360_vm3, %v2390_v11 }
 0x2fb   : > { %1425 = vmatpush1.bf16.msra.mxu1 %v1417_v13  ;;  %1456 = vmatprep.mubr.bf16.mxu1 %v2511_v15 }
 0x2fc   : > { %1488 = vmatprep.subr.bf16.mxu1 %v1482_v14 }
 0x302   : > { %2393 = vmatmul.mubr.msk.bf16.vlgmr.msra.gmra.mrb[20].mxu1 %vm360_vm3, %v2392_v25 }
 0x303   : > { %1489 = vmatpush1.bf16.msra.mxu1 %v1481_v27  ;;  %1520 = vmatprep.mubr.bf16.mxu1 %v2511_v15 }
 0x304   : > { %1544 = vmatprep.subr.bf16.mxu1 %v1538_v28 }
 0x30a   : > { %2395 = vmatmul.mubr.msk.bf16.vlgmr.msra.gmra.mrb[24].mxu1 %vm360_vm3, %v2394_v32 }
 0x30b   : > { %1545 = vmatpush1.bf16.msra.mxu1 %v1537_v10  ;;  %1576 = vmatprep.mubr.bf16.mxu1 %v2511_v15 }
 0x30c   : > { %1608 = vmatprep.subr.bf16.mxu1 %v1602_v36 }
 0x312   : > { %2397 = vmatmul.mubr.msk.bf16.vlgmr.msra.gmra.mrb[28].mxu1 %vm360_vm3, %v2396_v41 }
 0x313   : > { %1609 = vmatpush1.bf16.msra.mxu1 %v1601_v42  ;;  %1640 = vmatprep.mubr.bf16.mxu1 %v2511_v15 }
 0x31a   : > { %2399 = vmatmul.mubr.msk.bf16.vlgmr.msra.gmra.mrb[32].mxu1 %vm360_vm3, %v2398_v44 }
 0x31b   : > { %1779 = vmatprep.mubr.bf16.mxu1 %v2511_v15 }
 0x3ad   : > { %v1166_v39 = vpop.f32.mrb[0].mxu1 }
 0x3ae   : > { %v1168_v43 = vpop.f32.mrb[1].mxu1 }
 0x3af   : > { %v1170_v12 = vpop.f32.mrb[2].mxu1 }
 0x3b0   : > { %v1171_v45 = vpop.f32.mrb[3].mxu1 }
 0x3b5   : > { %v1220_v47 = vpop.f32.mrb[4].mxu1 }
 0x3b6   : > { %v1221_v48 = vadd.f32 %v1220_v47, %v1166_v39  ;;  %v1222_v49 = vpop.f32.mrb[5].mxu1 }
 0x3b7   : > { %v1223_v51 = vadd.f32 %v1222_v49, %v1168_v43  ;;  %v1224_v52 = vpop.f32.mrb[6].mxu1 }
 0x3b8   : > { %v1225_v53 = vpop.f32.mrb[7].mxu1 }
 0x3bd   : > { %v1282_v55 = vpop.f32.mrb[8].mxu1 }
 0x3be   : > { %v1289_v56 = vadd.f32 %v1282_v55, %v1221_v48  ;;  %v1284_v57 = vpop.f32.mrb[9].mxu1 }
 0x3bf   : > { %v1290_v59 = vadd.f32 %v1284_v57, %v1223_v51  ;;  %v1286_v60 = vpop.f32.mrb[10].mxu1  ;;  %v1655_v51 = vpop.permute.xlu1 %1654 }
 0x3c0   : > { %v1287_v62 = vpop.f32.mrb[11].mxu1 }
 0x3c5   : > { %v1346_v63 = vpop.f32.mrb[12].mxu1 }
 0x3c6   : > { %v1353_v1 = vadd.f32 %v1346_v63, %v1289_v56  ;;  %v1348_v2 = vpop.f32.mrb[13].mxu1 }
 0x3c7   : > { %v1354_v3 = vadd.f32 %v1348_v2, %v1290_v59  ;;  %v1350_v6 = vpop.f32.mrb[14].mxu1 }
 0x3c8   : > { %v1351_v7 = vpop.f32.mrb[15].mxu1 }
 0x3cd   : > { %v1394_v8 = vpop.f32.mrb[16].mxu1 }
 0x3ce   : > { %v1401_v9 = vadd.f32 %v1394_v8, %v1353_v1  ;;  %v1396_v11 = vpop.f32.mrb[17].mxu1 }
 0x3cf   : > { %v1402_v16 = vadd.f32 %v1396_v11, %v1354_v3  ;;  %v1398_v13 = vpop.f32.mrb[18].mxu1 }
 0x3d0   : > { %v1399_v14 = vpop.f32.mrb[19].mxu1 }
 0x3d5   : > { %v1458_v19 = vpop.f32.mrb[20].mxu1 }
 0x3d6   : > { %v1465_v25 = vadd.f32 %v1458_v19, %v1401_v9  ;;  %v1460_v26 = vpop.f32.mrb[21].mxu1 }
 0x3d7   : > { %v1466_v27 = vadd.f32 %v1460_v26, %v1402_v16  ;;  %v1462_v28 = vpop.f32.mrb[22].mxu1 }
 0x3d8   : > { %v1463_v29 = vpop.f32.mrb[23].mxu1 }
 0x3dd   : > { %v1522_v32 = vpop.f32.mrb[24].mxu1 }
 0x3de   : > { %v1529_v34 = vadd.f32 %v1522_v32, %v1465_v25  ;;  %v1524_v10 = vpop.f32.mrb[25].mxu1 }
 0x3df   : > { %v1530_v36 = vadd.f32 %v1524_v10, %v1466_v27  ;;  %v1526_v37 = vpop.f32.mrb[26].mxu1  ;;  %v2232_v27 = vld [vmem:[%s3091_s7] sm:$0x7] }
 0x3e0   : > { %v1527_v41 = vpop.f32.mrb[27].mxu1  ;;  %v2400_v10 = vld [vmem:[%s3090_s6 + $0x2] sm:$0x3] }
 0x3e5   : > { %v1578_v42 = vpop.f32.mrb[28].mxu1 }
 0x3e6   : > { %v1585_v44 = vadd.f32 %v1578_v42, %v1529_v34  ;;  %v1580_v39 = vpop.f32.mrb[29].mxu1 }
 0x3e7   : > { %v1586_v43 = vadd.f32 %v1580_v39, %v1530_v36  ;;  %v1582_v12 = vpop.f32.mrb[30].mxu1 }
 0x3e8   : > { %v1583_v45 = vpop.f32.mrb[31].mxu1 }
 0x3ed   : > { %v1642_v47 = vpop.f32.mrb[32].mxu1 }
 0x3ee   : > { %v1649_v48 = vadd.f32 %v1642_v47, %v1585_v44  ;;  %v1644_v49 = vpop.f32.mrb[33].mxu1  ;;  %v1663_v44 = vld [vmem:[%s3090_s6] sm:$0x3]  ;;  %v2405_v47 = vld [vmem:[%s3090_s6 + $0x4] sm:$0x3] }
 0x3ef   : > { %v1650_v52 = vadd.f32 %v1644_v49, %v1586_v43  ;;  %v1646_v53 = vpop.f32.mrb[34].mxu1 }
 0x3f0   : > { %v1657_v55 = vadd.f32 %v1655_v51, %v1649_v48  ;;  %v1647_v56 = vpop.f32.mrb[35].mxu1 }
 0x3f1   : > { %v1658_v57 = vadd.f32 %v1655_v51, %v1650_v52 }
 0x3f2   : > { %v1659_v59 = vmax.f32 %v1657_v55, 0.0 }
 0x3f3   : > { %v1660_v60 = vmax.f32 %v1658_v57, 0.0 }
 0x3f4   : > { %v2948_v62 = vpack.c.bf16 %v1659_v59, %v1659_v59  ;;  %v1661_v63 = vmul.f32 %v1659_v59, %v2636_v23  ;;  %v1788_v6 = vmul.f32 %v1659_v59, %v2640_v24  ;;  %v1854_v9 = vmul.f32 %v1659_v59, %v2658_v38 }
 0x3f5   : > { %v2951_v1 = vpack.c.bf16 %v1660_v60, %v1660_v60  ;;  %v1662_v2 = vmul.f32 %v1660_v60, %v2627_v20  ;;  %v1789_v8 = vmul.f32 %v1660_v60, %v2629_v21  ;;  %v1855_v11 = vmul.f32 %v1660_v60, %v2646_v31 }
 0x3f6   : > { %1672 = vrot.lane.b32.xlu0 %v2948_v62, %s2509_s19  ;;  %v1664_v3 = vpack.c.bf16 %v1661_v63, %v1661_v63  ;;  %v1792_v23 = vpack.c.bf16 %v1788_v6, %v1788_v6  ;;  %v1858_v16 = vpack.c.bf16 %v1854_v9, %v1854_v9  ;;  %v1974_v24 = vmul.f32 %v1659_v59, %v2652_v35  ;;  %v2414_v6 = vld [vmem:[%s3090_s6 + $0xa] sm:$0x3] }
 0x3f7   : > { %1674 = vrot.lane.b32.xlu1 %v2951_v1, %s2509_s19  ;;  %v1665_v7 = vpack.c.bf16 %v1662_v2, %v1662_v2  ;;  %v1793_v20 = vpack.c.bf16 %v1789_v8, %v1789_v8  ;;  %v1859_v13 = vpack.c.bf16 %v1855_v11, %v1855_v11  ;;  %v1975_v21 = vmul.f32 %v1660_v60, %v2673_v46 }
 0x3f8   : > { %v1978_v14 = vpack.c.bf16 %v1974_v24, %v1974_v24  ;;  %v2040_v38 = vmul.f32 %v1659_v59, %v2684_v54  ;;  %v2041_v31 = vmul.f32 %v1660_v60, %v2697_v61  ;;  %v2166_v35 = vmul.f32 %v1659_v59, %v2729_v22 }
 0x3f9   : > { %v1979_v19 = vpack.c.bf16 %v1975_v21, %v1975_v21  ;;  %v2167_v46 = vmul.f32 %v1660_v60, %v2742_v33  ;;  %v1926_v52 = vsel %vm1682_vm10, %v2948_v62, 0  ;;  %v2423_v21 = vld [vmem:[%s3090_s6 + $0x10] sm:$0x3] }
 0x3fa   : > { %1732 = vrot.lane.b32.xlu0 %v1664_v3, %s2512_s21  ;;  %v2044_v25 = vpack.c.bf16 %v2040_v38, %v2040_v38  ;;  %v2045_v26 = vpack.c.bf16 %v2041_v31, %v2041_v31  ;;  %v2170_v54 = vpack.c.bf16 %v2166_v35, %v2166_v35 }
 0x3fb   : > { %1734 = vrot.lane.b32.xlu1 %v1665_v7, %s2512_s21  ;;  %v2171_v61 = vpack.c.bf16 %v2167_v46, %v2167_v46 }
 0x3fe   : > { %1796 = vrot.lane.b32.xlu0 %v1792_v23, %s2510_s20 }
 0x3ff   : > { %1798 = vrot.lane.b32.xlu1 %v1793_v20, %s2510_s20  ;;  %v2417_v20 = vld [vmem:[%s3090_s6 + $0xc] sm:$0x3] }
 0x402   : > { %1862 = vrot.lane.b32.xlu0 %v1858_v16, %s2507_s18 }
 0x403   : > { %1864 = vrot.lane.b32.xlu1 %v1859_v13, %s2507_s18  ;;  %v2420_v13 = vld [vmem:[%s3090_s6 + $0xe] sm:$0x3] }
 0x406   : > { %1982 = vrot.lane.b32.xlu0 %v1978_v14, %s2506_s17 }
 0x407   : > { %1984 = vrot.lane.b32.xlu1 %v1979_v19, %s2506_s17 }
 0x40a   : > { %2048 = vrot.lane.b32.xlu0 %v2044_v25, %s2505_s12 }
 0x40b   : > { %2050 = vrot.lane.b32.xlu1 %v2045_v26, %s2505_s12  ;;  %s305_s12 = scalar_lea.vmem %s3092_s8, %s2428_s13 }
 0x40e   : > { %2108 = vrot.lane.b32.xlu0 %v2948_v62, %s2513_s24  ;;  %v2411_v62 = vld [vmem:[%s3090_s6 + $0x8] sm:$0x3] }
 0x40f   : > { %2110 = vrot.lane.b32.xlu1 %v2951_v1, %s2513_s24 }
 0x412   : > { %2174 = vrot.lane.b32.xlu0 %v2170_v54, %s2504_s11 }
 0x413   : > { %2176 = vrot.lane.b32.xlu1 %v2171_v61, %s2504_s11 }
 0x416   : > { %2235 = vperm.xlu0 %2480, %v2232_v27  }
 0x468   : > { %v1673_v22 = vpop.permute.xlu0 %1672 }
 0x469   : > { %v1676_v33 = vsel %vm360_vm3, %v2660_v40, %v1673_v22  ;;  %v1675_v28 = vpop.permute.xlu1 %1674 }
 0x46a   : > { %v1684_v29 = vsel %vm1682_vm10, %v1676_v33, 0  ;;  %v1677_v32 = vsel %vm360_vm3, %v1673_v22, %v1675_v28 }
 0x46b   : > { %2401 = vmatprep.subr.msk.bf16.mxu0 %vm1682_vm10, %v1677_v32 }
 0x46c   : > { %1690 = vmatpush1.bf16.msra.mxu0 %v1684_v29  ;;  %v1733_v34 = vpop.permute.xlu0 %1732 }
 0x46d   : > { %v1736_v36 = vsel %vm431_vm8, %v2714_v5, %v1733_v34  ;;  %v1735_v37 = vpop.permute.xlu1 %1734 }
 0x46e   : > { %v1742_v40 = vsel %vm1682_vm10, %v1736_v36, 0  ;;  %v1737_v41 = vsel %vm431_vm8, %v1733_v34, %v1735_v37 }
 0x46f   : > { %2402 = vmatmul.mubr.msk.bf16.vlgmr.msra.gmra.mrb[4].mxu0 %vm1678_vm11, %v2400_v10  ;;  %2403 = vmatprep.subr.msk.bf16.mxu1 %vm1682_vm10, %v1737_v41 }
 0x470   : > { %1748 = vmatpush1.bf16.msra.mxu1 %v1742_v40  ;;  %v1797_v42 = vpop.permute.xlu0 %1796  ;;  %1843 = vmatprep.mubr.bf16.mxu0 %v2511_v15 }
 0x471   : > { %v1800_v5 = vsel %vm527_vm7, %v2724_v18, %v1797_v42  ;;  %v1799_v39 = vpop.permute.xlu1 %1798 }
 0x472   : > { %v1806_v43 = vsel %vm1682_vm10, %v1800_v5, 0  ;;  %v1801_v12 = vsel %vm527_vm7, %v1797_v42, %v1799_v39 }
 0x473   : > { %2404 = vmatmul.mubr.msk.bf16.vlgmr.msra.gmra.mrb[36].mxu1 %vm1678_vm11, %v1663_v44  ;;  %2406 = vmatprep.subr.msk.bf16.mxu0 %vm1682_vm10, %v1801_v12 }
 0x474   : > { %1812 = vmatpush1.bf16.msra.mxu0 %v1806_v43  ;;  %v1863_v45 = vpop.permute.xlu0 %1862  ;;  %1909 = vmatprep.mubr.bf16.mxu1 %v2511_v15 }
 0x475   : > { %v1866_v18 = vsel %vm618_vm4, %v2737_v30, %v1863_v45  ;;  %v1865_v48 = vpop.permute.xlu1 %1864  ;;  %2412 = vmatprep.subr.msk.bf16.mxu0 %vm1682_vm10, %v2951_v1  ;;  %v2408_v30 = vld [vmem:[%s3090_s6 + $0x6] sm:$0x3] }
 0x476   : > { %v1872_v49 = vsel %vm1682_vm10, %v1866_v18, 0  ;;  %v1867_v51 = vsel %vm618_vm4, %v1863_v45, %v1865_v48 }
 0x477   : > { %2407 = vmatmul.mubr.msk.bf16.vlgmr.msra.gmra.mrb[8].mxu0 %vm1678_vm11, %v2405_v47  ;;  %2409 = vmatprep.subr.msk.bf16.mxu1 %vm1682_vm10, %v1867_v51 }
 0x478   : > { %1878 = vmatpush1.bf16.msra.mxu1 %v1872_v49  ;;  %1932 = vmatpush1.bf16.msra.mxu0 %v1926_v52  ;;  %v1983_v53 = vpop.permute.xlu0 %1982 }
 0x479   : > { %v1985_v55 = vpop.permute.xlu1 %1984  ;;  %1963 = vmatprep.mubr.bf16.mxu0 %v2511_v15 }
 0x47a   : > { %v1986_v56 = vsel %vm590_vm2, %v1983_v53, %v1985_v55  ;;  %v1987_v57 = vsel %vm590_vm2, %v1985_v55, %v2769_v50 }
 0x47b   : > { %v1992_v59 = vsel %vm1682_vm10, %v1986_v56, 0  ;;  %2410 = vmatmul.mubr.msk.bf16.vlgmr.msra.gmra.mrb[40].mxu1 %vm1678_vm11, %v2408_v30  ;;  %2415 = vmatprep.subr.msk.bf16.mxu1 %vm1682_vm10, %v1987_v57 }
 0x47c   : > { %1998 = vmatpush1.bf16.msra.mxu1 %v1992_v59  ;;  %v2049_v60 = vpop.permute.xlu0 %2048  ;;  %2029 = vmatprep.mubr.bf16.mxu1 %v2511_v15 }
 0x47d   : > { %v2051_v63 = vpop.permute.xlu1 %2050 }
 0x47e   : > { %v2052_v1 = vsel %vm499_vm1, %v2049_v60, %v2051_v63  ;;  %v2053_v50 = vsel %vm499_vm1, %v2051_v63, %v2782_v58 }
 0x47f   : > { %v2058_v2 = vsel %vm1682_vm10, %v2052_v1, 0  ;;  %2413 = vmatmul.mubr.msk.bf16.vlgmr.msra.gmra.mrb[12].mxu0 %vm1678_vm11, %v2411_v62  ;;  %2418 = vmatprep.subr.msk.bf16.mxu0 %vm1682_vm10, %v2053_v50 }
 0x480   : > { %2064 = vmatpush1.bf16.msra.mxu0 %v2058_v2  ;;  %v2109_v3 = vpop.permute.xlu0 %2108  ;;  %2095 = vmatprep.mubr.bf16.mxu0 %v2511_v15 }
 0x481   : > { %v2111_v7 = vpop.permute.xlu1 %2110 }
 0x482   : > { %v2112_v8 = vsel %vm937_vm9, %v2109_v3, %v2111_v7  ;;  %v2113_v58 = vsel %vm937_vm9, %v2111_v7, %v2794_v0 }
 0x483   : > { %v2118_v23 = vsel %vm1682_vm10, %v2112_v8, 0  ;;  %2416 = vmatmul.mubr.msk.bf16.vlgmr.msra.gmra.mrb[44].mxu1 %vm1678_vm11, %v2414_v6  ;;  %2421 = vmatprep.subr.msk.bf16.mxu1 %vm1682_vm10, %v2113_v58 }
 0x484   : > { %2124 = vmatpush1.bf16.msra.mxu1 %v2118_v23  ;;  %v2175_v9 = vpop.permute.xlu0 %2174  ;;  %2155 = vmatprep.mubr.bf16.mxu1 %v2511_v15 }
 0x485   : > { %v2177_v11 = vpop.permute.xlu1 %2176 }
 0x486   : > { %v2178_v16 = vsel %vm327_vm0, %v2175_v9, %v2177_v11  ;;  %v2179_v0 = vsel %vm327_vm0, %v2177_v11, %v2814_v17 }
 0x487   : > { %v2184_v24 = vsel %vm1682_vm10, %v2178_v16, 0  ;;  %2419 = vmatmul.mubr.msk.bf16.vlgmr.msra.gmra.mrb[16].mxu0 %vm1678_vm11, %v2417_v20  ;;  %2424 = vmatprep.subr.msk.bf16.mxu0 %vm1682_vm10, %v2179_v0 }
 0x488   : > { %2190 = vmatpush1.bf16.msra.mxu0 %v2184_v24  ;;  %2221 = vmatprep.mubr.bf16.mxu0 %v2511_v15 }
 0x48b   : > { %2422 = vmatmul.mubr.msk.bf16.vlgmr.msra.gmra.mrb[48].mxu1 %vm1678_vm11, %v2420_v13 }
 0x48f   : > { %2425 = vmatmul.mubr.msk.bf16.vlgmr.msra.gmra.mrb[20].mxu0 %vm1678_vm11, %v2423_v21 }
 0x495   : > { %v2236_v3 = vpop.permute.xlu0 %2235 }
 0x542   : > { %v1723_v17 = vpop.f32.mrb[4].mxu0 }
 0x543   : > { %v1725_v14 = vpop.f32.mrb[5].mxu0 }
 0x544   : > { %v1727_v38 = vpop.f32.mrb[6].mxu0 }
 0x545   : > { %v1728_v19 = vpop.f32.mrb[7].mxu0 }
 0x546   : > { %v1781_v31 = vpop.f32.mrb[36].mxu1 }
 0x547   : > { %v1782_v25 = vadd.f32 %v1781_v31, %v1723_v17  ;;  %v1783_v26 = vpop.f32.mrb[37].mxu1 }
 0x548   : > { %v1784_v35 = vadd.f32 %v1783_v26, %v1725_v14  ;;  %v1785_v46 = vpop.f32.mrb[38].mxu1 }
 0x549   : > { %v1786_v54 = vpop.f32.mrb[39].mxu1 }
 0x54a   : > { %v1845_v61 = vpop.f32.mrb[8].mxu0 }
 0x54b   : > { %v1852_v15 = vadd.f32 %v1845_v61, %v1782_v25  ;;  %v1847_v27 = vpop.f32.mrb[9].mxu0 }
 0x54c   : > { %v1853_v22 = vadd.f32 %v1847_v27, %v1784_v35  ;;  %v1849_v33 = vpop.f32.mrb[10].mxu0 }
 0x54d   : > { %v1850_v28 = vpop.f32.mrb[11].mxu0 }
 0x54e   : > { %v1911_v29 = vpop.f32.mrb[40].mxu1 }
 0x54f   : > { %v1918_v32 = vadd.f32 %v1911_v29, %v1852_v15  ;;  %v1913_v34 = vpop.f32.mrb[41].mxu1 }
 0x550   : > { %v1919_v10 = vadd.f32 %v1913_v34, %v1853_v22  ;;  %v1915_v36 = vpop.f32.mrb[42].mxu1 }
 0x551   : > { %v1916_v37 = vpop.f32.mrb[43].mxu1 }
 0x552   : > { %v1965_v40 = vpop.f32.mrb[12].mxu0 }
 0x553   : > { %v1972_v41 = vadd.f32 %v1965_v40, %v1918_v32  ;;  %v1967_v42 = vpop.f32.mrb[13].mxu0 }
 0x554   : > { %v1973_v44 = vadd.f32 %v1967_v42, %v1919_v10  ;;  %v1969_v5 = vpop.f32.mrb[14].mxu0 }
 0x555   : > { %v1970_v39 = vpop.f32.mrb[15].mxu0 }
 0x556   : > { %v2031_v43 = vpop.f32.mrb[44].mxu1 }
 0x557   : > { %v2038_v12 = vadd.f32 %v2031_v43, %v1972_v41  ;;  %v2033_v45 = vpop.f32.mrb[45].mxu1 }
 0x558   : > { %v2039_v47 = vadd.f32 %v2033_v45, %v1973_v44  ;;  %v2035_v18 = vpop.f32.mrb[46].mxu1 }
 0x559   : > { %v2036_v48 = vpop.f32.mrb[47].mxu1 }
 0x55a   : > { %v2097_v49 = vpop.f32.mrb[16].mxu0 }
 0x55b   : > { %v2104_v51 = vadd.f32 %v2097_v49, %v2038_v12  ;;  %v2099_v52 = vpop.f32.mrb[17].mxu0 }
 0x55c   : > { %v2105_v53 = vadd.f32 %v2099_v52, %v2039_v47  ;;  %v2101_v30 = vpop.f32.mrb[18].mxu0 }
 0x55d   : > { %v2102_v55 = vpop.f32.mrb[19].mxu0 }
 0x55e   : > { %v2157_v56 = vpop.f32.mrb[48].mxu1 }
 0x55f   : > { %v2164_v57 = vadd.f32 %v2157_v56, %v2104_v51  ;;  %v2159_v59 = vpop.f32.mrb[49].mxu1 }
 0x560   : > { %v2165_v60 = vadd.f32 %v2159_v59, %v2105_v53  ;;  %v2161_v62 = vpop.f32.mrb[50].mxu1 }
 0x561   : > { %v2162_v63 = vpop.f32.mrb[51].mxu1 }
 0x562   : > { %v2223_v1 = vpop.f32.mrb[20].mxu0 }
 0x563   : > { %v2230_v50 = vadd.f32 %v2223_v1, %v2164_v57  ;;  %v2225_v2 = vpop.f32.mrb[21].mxu0 }
 0x564   : > { %v2231_v6 = vadd.f32 %v2225_v2, %v2165_v60  ;;  %v2227_v7 = vpop.f32.mrb[22].mxu0 }
 0x565   : > { %v2238_v8 = vadd.f32 %v2236_v3, %v2230_v50  ;;  %v2228_v58 = vpop.f32.mrb[23].mxu0 }
 0x566   : > { %v2239_v23 = vadd.f32 %v2236_v3, %v2231_v6 }
 0x567   : > { %v2240_v9 = vmul.f32 %v2238_v8, %v2238_v8 }
 0x568   : > { %v2241_v20 = vmul.f32 %v2239_v23, %v2239_v23 }
 0x569   : > { %v2244_v11 = vrot.slane %v2240_v9, 1  ;;  %v2250_v24 = vrot.slane %v2240_v9, 2 }
 0x56a   : > { %v2245_v16 = vrot.slane %v2241_v20, 1  ;;  %v2251_v21 = vrot.slane %v2241_v20, 2 }
 0x56b   : > { %v2248_v0 = vadd.f32 %v2244_v11, %v2240_v9 }
 0x56c   : > { %v2249_v13 = vadd.f32 %v2245_v16, %v2241_v20 }
 0x56d   : > { %v2254_v17 = vadd.f32 %v2250_v24, %v2248_v0 }
 0x56e   : > { %v2255_v14 = vadd.f32 %v2251_v21, %v2249_v13 }
 0x56f   : > { %v2256_v38 = vadd.f32 1e-12, %v2254_v17 }
 0x570   : > { %v2257_v19 = vadd.f32 1e-12, %v2255_v14 }
 0x571   : > { %2492 = vrsqrt.f32 %v2256_v38 }
 0x572   : > { %2494 = vrsqrt.f32 %v2257_v19 }
 0x57b   : > { %v2493_v31 = vpop.eup %2492 }
 0x57c   : > { %v2495_v25 = vpop.eup %2494  ;;  %v2263_v26 = vrot.slane %v2493_v31, %v2573_v4 }
 0x57d   : > { %v2267_v35 = vrot.slane %v2495_v25, %v2573_v4 }
 0x57e   : > { %v2268_v46 = vmul.f32 %v2263_v26, %v2238_v8 }
 0x57f   : > { %v2269_v54 = vmul.f32 %v2267_v35, %v2239_v23 }
 0x581   : > { %v2272_v61 = vcombine.low %v2268_v46, %v2269_v54 }
 0x583   : > { %2274 = vst [vmem:[%s305_s12] sm:$0x77] %v2272_v61 }
 0x584 PF: > { %s18_s27 = sadd.s32 1, %s2502_s27  }
 0x585   : > { %p15_p4 = scmp.ge.s32.totalorder %s18_s27, 4  }
 0x587   :  { %17 = sbr.rel (!%p15_p4) target bundleno = 1 (0x1), region = 107 }

</bundles_post_ra>
